<compile_context>
chip_gen: v6e
topology: v6e:2x2x1
jax: 0.10.0
libtpu: 0.0.40
codegen_flags: <defaults>
</compile_context>

<pallas_src>
import numpy as np
import jax
import jax.numpy as jnp
from jax.experimental import pallas as pl
from jax.experimental.pallas import tpu as pltpu


def _round_up(a, b):
    return ((a + b - 1) // b) * b


def _cdiv(a, b):
    return (a + b - 1) // b


def _make_infnet_kernel(hidden, y_dim, z_dim, inv_temp, hard,
                        gumbel_eps=1e-20, var_eps=1e-10):
    inv_temp = float(inv_temp)
    H, Y, Z = int(hidden), int(y_dim), int(z_dim)

    def _softplus(v):
        # log(1 + exp(v)), numerically safe, f32.
        return jnp.maximum(v, 0.0) + jnp.log(1.0 + jnp.exp(-jnp.abs(v)))

    def kernel(x_ref, u_ref, eps_ref,
               wx_ref, b1_ref, w2_ref, b2_ref, wl_ref, bl_ref,
               b3_ref, w4_ref, b4_ref, whead_ref, bhead_ref,
               wy_ref, byh_ref, out_ref):
        x = x_ref[...]                                         # (T, x_dim) f32

        # ---- fused x-path: x @ [w1 | w3x]  (bf16 operands, f32 acc) ----
        xw = jnp.dot(x.astype(jnp.bfloat16), wx_ref[...],
                     preferred_element_type=jnp.float32)       # (T, 2H)
        hx3 = xw[:, H:]                                        # x @ w3x (bias later)

        # ---- q(y|x) trunk: Linear -> ReLU -> Linear -> ReLU ----
        h = jnp.maximum(xw[:, :H] + b1_ref[...], 0.0)
        h = jnp.dot(h.astype(jnp.bfloat16), w2_ref[...],
                    preferred_element_type=jnp.float32) + b2_ref[...]
        h = jnp.maximum(h, 0.0)

        logits = jnp.dot(h.astype(jnp.bfloat16), wl_ref[...],
                         preferred_element_type=jnp.float32) + bl_ref[...]

        # exact softmax for the reported probabilities
        m = jnp.max(logits, axis=-1, keepdims=True)
        e = jnp.exp(logits - m)
        prob = e / jnp.sum(e, axis=-1, keepdims=True)

        # gumbel-softmax sample (all elementwise math stays in f32)
        u = u_ref[...]
        g = -jnp.log(-jnp.log(u + gumbel_eps) + gumbel_eps)
        zg = (logits + g) * inv_temp
        if hard:
            # one-hot from the pre-softmax scores, first index on ties
            # (torch.max semantics).  Forward value only.
            col = jax.lax.broadcasted_iota(jnp.int32, zg.shape, 1)
            is_max = zg == jnp.max(zg, axis=-1, keepdims=True)
            first = jnp.min(jnp.where(is_max, col, Y), axis=-1, keepdims=True)
            y = jnp.where(col == first, 1.0, 0.0).astype(jnp.float32)
        else:
            mz = jnp.max(zg, axis=-1, keepdims=True)
            ez = jnp.exp(zg - mz)
            denom = jnp.sum(ez, axis=-1, keepdims=True)
            y = ez * pl.reciprocal(denom, approx=True)

        # ---- fused y-path: y @ [w3y | w_ymu | w_yvar] ----
        yw = jnp.dot(y.astype(jnp.bfloat16), wy_ref[...],
                     preferred_element_type=jnp.float32)       # (T, H + 2Z)
        yheads = yw[:, H:] + byh_ref[...]
        y_mu = yheads[:, :Z]
        y_var = _softplus(yheads[:, Z:])

        # ---- q(z|x,y) trunk: Linear(cat(x,y)) -> ReLU -> Linear -> ReLU ----
        h2 = jnp.maximum(hx3 + yw[:, :H] + b3_ref[...], 0.0)
        h2 = jnp.dot(h2.astype(jnp.bfloat16), w4_ref[...],
                     preferred_element_type=jnp.float32) + b4_ref[...]
        h2 = jnp.maximum(h2, 0.0)

        # ---- fused Gaussian head: h2 @ [w_mu | w_var] ----
        heads = jnp.dot(h2.astype(jnp.bfloat16), whead_ref[...],
                        preferred_element_type=jnp.float32) + bhead_ref[...]
        mu = heads[:, :Z]
        var = _softplus(heads[:, Z:])
        z = mu + eps_ref[...] * jnp.sqrt(var + var_eps)

        # ---- single lane-dense output slab ----
        slab = jnp.concatenate([logits, prob, mu, var, z, y_mu, y_var], axis=-1)
        pad = out_ref.shape[-1] - slab.shape[-1]
        if pad > 0:
            slab = jnp.concatenate(
                [slab, jnp.zeros((slab.shape[0], pad), jnp.float32)], axis=-1)
        out_ref[...] = slab

    return kernel


def inference_net_forward(params, x, noise_key, temperature=1.0, hard=False,
                          max_tile_rows=1024):
    """x: (N, x_dim) float32.  Returns (z, (z, mu, var, y_mu, y_var, prob, logits))."""
    n, x_dim = x.shape
    hidden = params["w1"].shape[1]
    y_dim = params["w_logits"].shape[1]
    z_dim = params["w_mu"].shape[1]

    x = x.astype(jnp.float32)
    k_u, k_eps = jax.random.split(noise_key)
    u = jax.random.uniform(k_u, (n, y_dim), dtype=jnp.float32)     # gumbel U(0,1)
    eps = jax.random.normal(k_eps, (n, z_dim), dtype=jnp.float32)  # gaussian N(0,1)

    # Row tiling: multiple of 16 (bf16 sublane packing); aim for >=2 grid steps
    # so the parallel axis can shard across both TensorCores on v7x.
    tile = min(max_tile_rows, _round_up(n, 16))
    if n >= 32 and _cdiv(_round_up(n, 16), tile) < 2:
        tile = _round_up(_cdiv(n, 2), 16)
    n_pad = _round_up(n, tile)
    if n_pad != n:
        pad = ((0, n_pad - n), (0, 0))
        x = jnp.pad(x, pad)
        u = jnp.pad(u, pad)
        eps = jnp.pad(eps, pad)
    num_tiles = n_pad // tile

    # ---- weight prep: concat fused heads, cast matmul weights to bf16 once ----
    bf16, f32 = jnp.bfloat16, jnp.float32
    w_x = jnp.concatenate([params["w1"], params["w3x"]], axis=1).astype(bf16)
    w2 = params["w2"].astype(bf16)
    wl = params["w_logits"].astype(bf16)
    w4 = params["w4"].astype(bf16)
    w_head = jnp.concatenate([params["w_mu"], params["w_var"]], axis=1).astype(bf16)
    w_y = jnp.concatenate([params["w3y"], params["w_ymu"], params["w_yvar"]],
                          axis=1).astype(bf16)
    b1 = params["b1"].astype(f32)
    b2 = params["b2"].astype(f32)
    bl = params["b_logits"].astype(f32)
    b3 = params["b3"].astype(f32)
    b4 = params["b4"].astype(f32)
    b_head = jnp.concatenate([params["b_mu"], params["b_var"]], axis=1).astype(f32)
    b_yh = jnp.concatenate([params["b_ymu"], params["b_yvar"]], axis=1).astype(f32)

    weights = [w_x, b1, w2, b2, wl, bl, b3, w4, b4, w_head, b_head, w_y, b_yh]

    def row_spec(d):
        return pl.BlockSpec((tile, d), lambda i: (i, 0))

    def full_spec(a):
        return pl.BlockSpec(a.shape, lambda i: (0, 0))   # resident across grid

    slab_w = _round_up(2 * y_dim + 5 * z_dim, 128)

    in_specs = ([row_spec(x_dim), row_spec(y_dim), row_spec(z_dim)]
                + [full_spec(w) for w in weights])
    out_specs = pl.BlockSpec((tile, slab_w), lambda i: (i, 0))
    out_shape = jax.ShapeDtypeStruct((n_pad, slab_w), jnp.float32)

    kernel = _make_infnet_kernel(hidden, y_dim, z_dim,
                                 1.0 / float(temperature), bool(hard))

    slab = pl.pallas_call(
        kernel,
        grid=(num_tiles,),
        in_specs=in_specs,
        out_specs=out_specs,
        out_shape=out_shape,
        compiler_params=pltpu.CompilerParams(
            dimension_semantics=("parallel",),
            vmem_limit_bytes=48 * 1024 * 1024),
    )(x, u, eps, *weights)

    # unpack the slab: [logits | prob | mu | var | z | y_mu | y_var | pad]
    outs = {}
    off = 0
    for name, d in (("logits", y_dim), ("prob", y_dim), ("mu", z_dim),
                    ("var", z_dim), ("z", z_dim), ("y_mu", z_dim),
                    ("y_var", z_dim)):
        outs[name] = slab[:n, off:off + d]
        off += d

    z = outs["z"]
    return z, (z, outs["mu"], outs["var"], outs["y_mu"], outs["y_var"],
               outs["prob"], outs["logits"])


# -------------------- deterministic PyTorch-style init --------------------

def _init_linear(key, in_dim, out_dim):
    kw, kb = jax.random.split(key)
    bound = 1.0 / np.sqrt(in_dim)
    w = jax.random.uniform(kw, (in_dim, out_dim), jnp.float32, -bound, bound)
    b = jax.random.uniform(kb, (1, out_dim), jnp.float32, -bound, bound)
    return w, b


def make_params(key, x_dim, z_dim, y_dim, hidden=512):
    ks = jax.random.split(key, 9)
    w1, b1 = _init_linear(ks[0], x_dim, hidden)              # qyx Linear(x_dim, 512)
    w2, b2 = _init_linear(ks[1], hidden, hidden)             # qyx Linear(512, 512)
    wl, bl = _init_linear(ks[2], hidden, y_dim)              # GumbelSoftmax logits
    w3, b3 = _init_linear(ks[3], x_dim + y_dim, hidden)      # qzyx Linear(x+y, 512)
    w4, b4 = _init_linear(ks[4], hidden, hidden)             # qzyx Linear(512, 512)
    wmu, bmu = _init_linear(ks[5], hidden, z_dim)            # Gaussian mu
    wvar, bvar = _init_linear(ks[6], hidden, z_dim)          # Gaussian var
    wymu, bymu = _init_linear(ks[7], y_dim, z_dim)           # y_mu
    wyvar, byvar = _init_linear(ks[8], y_dim, z_dim)         # y_var
    return dict(w1=w1, b1=b1, w2=w2, b2=b2, w_logits=wl, b_logits=bl,
                w3x=w3[:x_dim], w3y=w3[x_dim:], b3=b3, w4=w4, b4=b4,
                w_mu=wmu, b_mu=bmu, w_var=wvar, b_var=bvar,
                w_ymu=wymu, b_ymu=bymu, w_yvar=wyvar, b_yvar=byvar)


if __name__ == "__main__":
    x_dim, z_dim, y_dim = 32, 16, 16
    batch = 16   # rows; forward implies 2-D x (it is cat'd with y on dim=1)

    key = jax.random.PRNGKey(0)
    k_params, k_x, k_noise = jax.random.split(key, 3)

    params = make_params(k_params, x_dim, z_dim, y_dim)
    x = jax.random.normal(k_x, (batch, x_dim), jnp.float32)

    # soft path
    z, (z2, mu, var, y_mu, y_var, prob, logits) = inference_net_forward(
        params, x, k_noise, temperature=1.0, hard=False)
    jax.block_until_ready((z, mu, var, y_mu, y_var, prob, logits))

    assert z.shape == (batch, z_dim) and mu.shape == (batch, z_dim)
    assert var.shape == (batch, z_dim) and y_mu.shape == (batch, z_dim)
    assert y_var.shape == (batch, z_dim)
    assert prob.shape == (batch, y_dim) and logits.shape == (batch, y_dim)
    for a in (z, mu, var, y_mu, y_var, prob, logits):
        assert np.all(np.isfinite(np.asarray(a)))
    assert np.asarray(var).min() >= 0.0 and np.asarray(y_var).min() >= 0.0
    # prob uses an exact softmax division -> tight tolerance
    assert np.allclose(np.asarray(prob).sum(-1), 1.0, atol=1e-3)

    # hard (one-hot forward) path
    zh, (_, muh, varh, y_muh, y_varh, probh, logitsh) = inference_net_forward(
        params, x, k_noise, temperature=1.0, hard=True)
    jax.block_until_ready((zh, muh, varh, y_muh, y_varh, probh, logitsh))
    for a in (zh, muh, varh, y_muh, y_varh, probh, logitsh):
        assert np.all(np.isfinite(np.asarray(a)))
    assert np.asarray(varh).min() >= 0.0 and np.asarray(y_varh).min() >= 0.0

    print("KERNEL_OK")
</pallas_src>

<mosaic_0001>
module attributes {stable_mosaic.version = 11 : i64} {
  func.func @kernel(%arg0: i32, %arg1: memref<16x32xf32, #tpu.memory_space<vmem>>, %arg2: memref<16x16xf32, #tpu.memory_space<vmem>>, %arg3: memref<16x16xf32, #tpu.memory_space<vmem>>, %arg4: memref<32x1024xbf16, #tpu.memory_space<vmem>>, %arg5: memref<1x512xf32, #tpu.memory_space<vmem>>, %arg6: memref<512x512xbf16, #tpu.memory_space<vmem>>, %arg7: memref<1x512xf32, #tpu.memory_space<vmem>>, %arg8: memref<512x16xbf16, #tpu.memory_space<vmem>>, %arg9: memref<1x16xf32, #tpu.memory_space<vmem>>, %arg10: memref<1x512xf32, #tpu.memory_space<vmem>>, %arg11: memref<512x512xbf16, #tpu.memory_space<vmem>>, %arg12: memref<1x512xf32, #tpu.memory_space<vmem>>, %arg13: memref<512x32xbf16, #tpu.memory_space<vmem>>, %arg14: memref<1x32xf32, #tpu.memory_space<vmem>>, %arg15: memref<16x544xbf16, #tpu.memory_space<vmem>>, %arg16: memref<1x32xf32, #tpu.memory_space<vmem>>, %arg17: memref<16x128xf32, #tpu.memory_space<vmem>>) attributes {dimension_semantics = [#tpu.dimension_semantics<parallel>], iteration_bounds = array<i64: 1>, scalar_prefetch = 0 : i64, scratch_operands = 0 : i64, tpu.core_type = #tpu.core_type<tc>, window_params = [{transform_indices = @transform_0, window_bounds = array<i64: 16, 32>}, {transform_indices = @transform_1, window_bounds = array<i64: 16, 16>}, {transform_indices = @transform_2, window_bounds = array<i64: 16, 16>}, {pipeline_mode = #tpu.pipeline_mode<synchronous>, transform_indices = @transform_3, window_bounds = array<i64: 32, 1024>}, {pipeline_mode = #tpu.pipeline_mode<synchronous>, transform_indices = @transform_4, window_bounds = array<i64: 1, 512>}, {pipeline_mode = #tpu.pipeline_mode<synchronous>, transform_indices = @transform_5, window_bounds = array<i64: 512, 512>}, {pipeline_mode = #tpu.pipeline_mode<synchronous>, transform_indices = @transform_6, window_bounds = array<i64: 1, 512>}, {pipeline_mode = #tpu.pipeline_mode<synchronous>, transform_indices = @transform_7, window_bounds = array<i64: 512, 16>}, {pipeline_mode = #tpu.pipeline_mode<synchronous>, transform_indices = @transform_8, window_bounds = array<i64: 1, 16>}, {pipeline_mode = #tpu.pipeline_mode<synchronous>, transform_indices = @transform_9, window_bounds = array<i64: 1, 512>}, {pipeline_mode = #tpu.pipeline_mode<synchronous>, transform_indices = @transform_10, window_bounds = array<i64: 512, 512>}, {pipeline_mode = #tpu.pipeline_mode<synchronous>, transform_indices = @transform_11, window_bounds = array<i64: 1, 512>}, {pipeline_mode = #tpu.pipeline_mode<synchronous>, transform_indices = @transform_12, window_bounds = array<i64: 512, 32>}, {pipeline_mode = #tpu.pipeline_mode<synchronous>, transform_indices = @transform_13, window_bounds = array<i64: 1, 32>}, {pipeline_mode = #tpu.pipeline_mode<synchronous>, transform_indices = @transform_14, window_bounds = array<i64: 16, 544>}, {pipeline_mode = #tpu.pipeline_mode<synchronous>, transform_indices = @transform_15, window_bounds = array<i64: 1, 32>}, {transform_indices = @transform_16, window_bounds = array<i64: 16, 128>}]} {
    %c0 = arith.constant 0 : index
    %c0_0 = arith.constant 0 : index
    %0 = vector.load %arg1[%c0, %c0_0] : memref<16x32xf32, #tpu.memory_space<vmem>>, vector<16x32xf32>
    %1 = arith.truncf %0 : vector<16x32xf32> to vector<16x32xbf16>
    %c0_1 = arith.constant 0 : index
    %c0_2 = arith.constant 0 : index
    %2 = vector.load %arg4[%c0_1, %c0_2] : memref<32x1024xbf16, #tpu.memory_space<vmem>>, vector<32x1024xbf16>
    %cst = arith.constant dense<0.000000e+00> : vector<16x1024xf32>
    %3 = tpu.matmul %1, %2, %cst {dimension_numbers = #tpu.dot_dimension_numbers<[1], [0], [0], [1], [0, 0, 1, 1], [], []>} : vector<16x32xbf16>, vector<32x1024xbf16>, vector<16x1024xf32> -> vector<16x1024xf32>
    %4 = vector.extract_strided_slice %3 {offsets = [0, 512], sizes = [16, 512], strides = [1, 1]} : vector<16x1024xf32> to vector<16x512xf32>
    %5 = vector.extract_strided_slice %3 {offsets = [0, 0], sizes = [16, 512], strides = [1, 1]} : vector<16x1024xf32> to vector<16x512xf32>
    %c0_3 = arith.constant 0 : index
    %c0_4 = arith.constant 0 : index
    %6 = vector.load %arg5[%c0_3, %c0_4] : memref<1x512xf32, #tpu.memory_space<vmem>>, vector<1x512xf32>
    %7 = vector.broadcast %6 : vector<1x512xf32> to vector<16x512xf32>
    %8 = arith.addf %5, %7 : vector<16x512xf32>
    %cst_5 = arith.constant 0.000000e+00 : f32
    %9 = vector.broadcast %cst_5 : f32 to vector<16x512xf32>
    %10 = arith.maximumf %8, %9 : vector<16x512xf32>
    %11 = arith.truncf %10 : vector<16x512xf32> to vector<16x512xbf16>
    %c0_6 = arith.constant 0 : index
    %c0_7 = arith.constant 0 : index
    %12 = vector.load %arg6[%c0_6, %c0_7] : memref<512x512xbf16, #tpu.memory_space<vmem>>, vector<512x512xbf16>
    %cst_8 = arith.constant dense<0.000000e+00> : vector<16x512xf32>
    %13 = tpu.matmul %11, %12, %cst_8 {dimension_numbers = #tpu.dot_dimension_numbers<[1], [0], [0], [1], [0, 0, 1, 1], [], []>} : vector<16x512xbf16>, vector<512x512xbf16>, vector<16x512xf32> -> vector<16x512xf32>
    %c0_9 = arith.constant 0 : index
    %c0_10 = arith.constant 0 : index
    %14 = vector.load %arg7[%c0_9, %c0_10] : memref<1x512xf32, #tpu.memory_space<vmem>>, vector<1x512xf32>
    %15 = vector.broadcast %14 : vector<1x512xf32> to vector<16x512xf32>
    %16 = arith.addf %13, %15 : vector<16x512xf32>
    %cst_11 = arith.constant 0.000000e+00 : f32
    %17 = vector.broadcast %cst_11 : f32 to vector<16x512xf32>
    %18 = arith.maximumf %16, %17 : vector<16x512xf32>
    %19 = arith.truncf %18 : vector<16x512xf32> to vector<16x512xbf16>
    %c0_12 = arith.constant 0 : index
    %c0_13 = arith.constant 0 : index
    %20 = vector.load %arg8[%c0_12, %c0_13] : memref<512x16xbf16, #tpu.memory_space<vmem>>, vector<512x16xbf16>
    %cst_14 = arith.constant dense<0.000000e+00> : vector<16x16xf32>
    %21 = tpu.matmul %19, %20, %cst_14 {dimension_numbers = #tpu.dot_dimension_numbers<[1], [0], [0], [1], [0, 0, 1, 1], [], []>} : vector<16x512xbf16>, vector<512x16xbf16>, vector<16x16xf32> -> vector<16x16xf32>
    %c0_15 = arith.constant 0 : index
    %c0_16 = arith.constant 0 : index
    %22 = vector.load %arg9[%c0_15, %c0_16] : memref<1x16xf32, #tpu.memory_space<vmem>>, vector<1x16xf32>
    %23 = vector.broadcast %22 : vector<1x16xf32> to vector<16x16xf32>
    %24 = arith.addf %21, %23 : vector<16x16xf32>
    %cst_17 = arith.constant dense<0xFF800000> : vector<16xf32>
    %25 = vector.multi_reduction <maximumf>, %24, %cst_17 [1] : vector<16x16xf32> to vector<16xf32>
    %26 = vector.shape_cast %25 : vector<16xf32> to vector<16x1xf32>
    %27 = vector.broadcast %26 : vector<16x1xf32> to vector<16x16xf32>
    %28 = arith.subf %24, %27 : vector<16x16xf32>
    %29 = math.exp %28 : vector<16x16xf32>
    %cst_18 = arith.constant dense<0.000000e+00> : vector<16xf32>
    %30 = vector.multi_reduction <add>, %29, %cst_18 [1] : vector<16x16xf32> to vector<16xf32>
    %31 = vector.shape_cast %30 : vector<16xf32> to vector<16x1xf32>
    %32 = vector.broadcast %31 : vector<16x1xf32> to vector<16x16xf32>
    %33 = arith.divf %29, %32 : vector<16x16xf32>
    %c0_19 = arith.constant 0 : index
    %c0_20 = arith.constant 0 : index
    %34 = vector.load %arg2[%c0_19, %c0_20] : memref<16x16xf32, #tpu.memory_space<vmem>>, vector<16x16xf32>
    %cst_21 = arith.constant 9.99999968E-21 : f32
    %35 = vector.broadcast %cst_21 : f32 to vector<16x16xf32>
    %36 = arith.addf %34, %35 : vector<16x16xf32>
    %37 = math.log %36 : vector<16x16xf32>
    %cst_22 = arith.constant 0.000000e+00 : f32
    %38 = vector.broadcast %cst_22 : f32 to vector<16x16xf32>
    %39 = arith.subf %38, %37 : vector<16x16xf32>
    %cst_23 = arith.constant 9.99999968E-21 : f32
    %40 = vector.broadcast %cst_23 : f32 to vector<16x16xf32>
    %41 = arith.addf %39, %40 : vector<16x16xf32>
    %42 = math.log %41 : vector<16x16xf32>
    %cst_24 = arith.constant 0.000000e+00 : f32
    %43 = vector.broadcast %cst_24 : f32 to vector<16x16xf32>
    %44 = arith.subf %43, %42 : vector<16x16xf32>
    %45 = arith.addf %24, %44 : vector<16x16xf32>
    %cst_25 = arith.constant 1.000000e+00 : f32
    %46 = vector.broadcast %cst_25 : f32 to vector<16x16xf32>
    %47 = arith.mulf %45, %46 : vector<16x16xf32>
    %cst_26 = arith.constant dense<0xFF800000> : vector<16xf32>
    %48 = vector.multi_reduction <maximumf>, %47, %cst_26 [1] : vector<16x16xf32> to vector<16xf32>
    %49 = vector.shape_cast %48 : vector<16xf32> to vector<16x1xf32>
    %50 = vector.broadcast %49 : vector<16x1xf32> to vector<16x16xf32>
    %51 = arith.subf %47, %50 : vector<16x16xf32>
    %52 = math.exp %51 : vector<16x16xf32>
    %cst_27 = arith.constant dense<0.000000e+00> : vector<16xf32>
    %53 = vector.multi_reduction <add>, %52, %cst_27 [1] : vector<16x16xf32> to vector<16xf32>
    %54 = vector.shape_cast %53 : vector<16xf32> to vector<16x1xf32>
    %55 = tpu.reciprocal %54 {approx = true} : vector<16x1xf32> -> vector<16x1xf32>
    %56 = vector.broadcast %55 : vector<16x1xf32> to vector<16x16xf32>
    %57 = arith.mulf %52, %56 : vector<16x16xf32>
    %58 = arith.truncf %57 : vector<16x16xf32> to vector<16x16xbf16>
    %c0_28 = arith.constant 0 : index
    %c0_29 = arith.constant 0 : index
    %59 = vector.load %arg15[%c0_28, %c0_29] : memref<16x544xbf16, #tpu.memory_space<vmem>>, vector<16x544xbf16>
    %cst_30 = arith.constant dense<0.000000e+00> : vector<16x544xf32>
    %60 = tpu.matmul %58, %59, %cst_30 {dimension_numbers = #tpu.dot_dimension_numbers<[1], [0], [0], [1], [0, 0, 1, 1], [], []>} : vector<16x16xbf16>, vector<16x544xbf16>, vector<16x544xf32> -> vector<16x544xf32>
    %61 = vector.extract_strided_slice %60 {offsets = [0, 512], sizes = [16, 32], strides = [1, 1]} : vector<16x544xf32> to vector<16x32xf32>
    %c0_31 = arith.constant 0 : index
    %c0_32 = arith.constant 0 : index
    %62 = vector.load %arg16[%c0_31, %c0_32] : memref<1x32xf32, #tpu.memory_space<vmem>>, vector<1x32xf32>
    %63 = vector.broadcast %62 : vector<1x32xf32> to vector<16x32xf32>
    %64 = arith.addf %61, %63 : vector<16x32xf32>
    %65 = vector.extract_strided_slice %64 {offsets = [0, 0], sizes = [16, 16], strides = [1, 1]} : vector<16x32xf32> to vector<16x16xf32>
    %66 = vector.extract_strided_slice %64 {offsets = [0, 16], sizes = [16, 16], strides = [1, 1]} : vector<16x32xf32> to vector<16x16xf32>
    %cst_33 = arith.constant 0.000000e+00 : f32
    %67 = vector.broadcast %cst_33 : f32 to vector<16x16xf32>
    %68 = arith.maximumf %66, %67 : vector<16x16xf32>
    %69 = math.absf %66 : vector<16x16xf32>
    %cst_34 = arith.constant 0.000000e+00 : f32
    %70 = vector.broadcast %cst_34 : f32 to vector<16x16xf32>
    %71 = arith.subf %70, %69 : vector<16x16xf32>
    %72 = math.exp %71 : vector<16x16xf32>
    %cst_35 = arith.constant 1.000000e+00 : f32
    %73 = vector.broadcast %cst_35 : f32 to vector<16x16xf32>
    %74 = arith.addf %73, %72 : vector<16x16xf32>
    %75 = math.log %74 : vector<16x16xf32>
    %76 = arith.addf %68, %75 : vector<16x16xf32>
    %77 = vector.extract_strided_slice %60 {offsets = [0, 0], sizes = [16, 512], strides = [1, 1]} : vector<16x544xf32> to vector<16x512xf32>
    %78 = arith.addf %4, %77 : vector<16x512xf32>
    %c0_36 = arith.constant 0 : index
    %c0_37 = arith.constant 0 : index
    %79 = vector.load %arg10[%c0_36, %c0_37] : memref<1x512xf32, #tpu.memory_space<vmem>>, vector<1x512xf32>
    %80 = vector.broadcast %79 : vector<1x512xf32> to vector<16x512xf32>
    %81 = arith.addf %78, %80 : vector<16x512xf32>
    %cst_38 = arith.constant 0.000000e+00 : f32
    %82 = vector.broadcast %cst_38 : f32 to vector<16x512xf32>
    %83 = arith.maximumf %81, %82 : vector<16x512xf32>
    %84 = arith.truncf %83 : vector<16x512xf32> to vector<16x512xbf16>
    %c0_39 = arith.constant 0 : index
    %c0_40 = arith.constant 0 : index
    %85 = vector.load %arg11[%c0_39, %c0_40] : memref<512x512xbf16, #tpu.memory_space<vmem>>, vector<512x512xbf16>
    %cst_41 = arith.constant dense<0.000000e+00> : vector<16x512xf32>
    %86 = tpu.matmul %84, %85, %cst_41 {dimension_numbers = #tpu.dot_dimension_numbers<[1], [0], [0], [1], [0, 0, 1, 1], [], []>} : vector<16x512xbf16>, vector<512x512xbf16>, vector<16x512xf32> -> vector<16x512xf32>
    %c0_42 = arith.constant 0 : index
    %c0_43 = arith.constant 0 : index
    %87 = vector.load %arg12[%c0_42, %c0_43] : memref<1x512xf32, #tpu.memory_space<vmem>>, vector<1x512xf32>
    %88 = vector.broadcast %87 : vector<1x512xf32> to vector<16x512xf32>
    %89 = arith.addf %86, %88 : vector<16x512xf32>
    %cst_44 = arith.constant 0.000000e+00 : f32
    %90 = vector.broadcast %cst_44 : f32 to vector<16x512xf32>
    %91 = arith.maximumf %89, %90 : vector<16x512xf32>
    %92 = arith.truncf %91 : vector<16x512xf32> to vector<16x512xbf16>
    %c0_45 = arith.constant 0 : index
    %c0_46 = arith.constant 0 : index
    %93 = vector.load %arg13[%c0_45, %c0_46] : memref<512x32xbf16, #tpu.memory_space<vmem>>, vector<512x32xbf16>
    %cst_47 = arith.constant dense<0.000000e+00> : vector<16x32xf32>
    %94 = tpu.matmul %92, %93, %cst_47 {dimension_numbers = #tpu.dot_dimension_numbers<[1], [0], [0], [1], [0, 0, 1, 1], [], []>} : vector<16x512xbf16>, vector<512x32xbf16>, vector<16x32xf32> -> vector<16x32xf32>
    %c0_48 = arith.constant 0 : index
    %c0_49 = arith.constant 0 : index
    %95 = vector.load %arg14[%c0_48, %c0_49] : memref<1x32xf32, #tpu.memory_space<vmem>>, vector<1x32xf32>
    %96 = vector.broadcast %95 : vector<1x32xf32> to vector<16x32xf32>
    %97 = arith.addf %94, %96 : vector<16x32xf32>
    %98 = vector.extract_strided_slice %97 {offsets = [0, 0], sizes = [16, 16], strides = [1, 1]} : vector<16x32xf32> to vector<16x16xf32>
    %99 = vector.extract_strided_slice %97 {offsets = [0, 16], sizes = [16, 16], strides = [1, 1]} : vector<16x32xf32> to vector<16x16xf32>
    %cst_50 = arith.constant 0.000000e+00 : f32
    %100 = vector.broadcast %cst_50 : f32 to vector<16x16xf32>
    %101 = arith.maximumf %99, %100 : vector<16x16xf32>
    %102 = math.absf %99 : vector<16x16xf32>
    %cst_51 = arith.constant 0.000000e+00 : f32
    %103 = vector.broadcast %cst_51 : f32 to vector<16x16xf32>
    %104 = arith.subf %103, %102 : vector<16x16xf32>
    %105 = math.exp %104 : vector<16x16xf32>
    %cst_52 = arith.constant 1.000000e+00 : f32
    %106 = vector.broadcast %cst_52 : f32 to vector<16x16xf32>
    %107 = arith.addf %106, %105 : vector<16x16xf32>
    %108 = math.log %107 : vector<16x16xf32>
    %109 = arith.addf %101, %108 : vector<16x16xf32>
    %c0_53 = arith.constant 0 : index
    %c0_54 = arith.constant 0 : index
    %110 = vector.load %arg3[%c0_53, %c0_54] : memref<16x16xf32, #tpu.memory_space<vmem>>, vector<16x16xf32>
    %cst_55 = arith.constant 1.000000e-10 : f32
    %111 = vector.broadcast %cst_55 : f32 to vector<16x16xf32>
    %112 = arith.addf %109, %111 : vector<16x16xf32>
    %113 = math.sqrt %112 : vector<16x16xf32>
    %114 = arith.mulf %110, %113 : vector<16x16xf32>
    %115 = arith.addf %98, %114 : vector<16x16xf32>
    %116 = tpu.concatenate %24, %33, %98, %109, %115, %65, %76 in 1 : vector<16x16xf32>, vector<16x16xf32>, vector<16x16xf32>, vector<16x16xf32>, vector<16x16xf32>, vector<16x16xf32>, vector<16x16xf32> -> vector<16x112xf32>
    %cst_56 = arith.constant 0.000000e+00 : f32
    %117 = vector.broadcast %cst_56 : f32 to vector<16x16xf32>
    %118 = tpu.concatenate %116, %117 in 1 : vector<16x112xf32>, vector<16x16xf32> -> vector<16x128xf32>
    %c0_57 = arith.constant 0 : index
    %c0_58 = arith.constant 0 : index
    %119 = vector.load %arg17[%c0_57, %c0_58] : memref<16x128xf32, #tpu.memory_space<vmem>>, vector<16x128xf32>
    tpu.vector_store %arg17[%c0_57, %c0_58], %118 {strides = array<i32>} : memref<16x128xf32, #tpu.memory_space<vmem>>, vector<16x128xf32>,
    return
  }
  func.func @transform_0(%arg0: i32) -> (i32, i32) {
    %c0_i32 = arith.constant 0 : i32
    %c0_i32_0 = arith.constant 0 : i32
    return %arg0, %c0_i32 : i32, i32
  }
  func.func @transform_1(%arg0: i32) -> (i32, i32) {
    %c0_i32 = arith.constant 0 : i32
    %c0_i32_0 = arith.constant 0 : i32
    return %arg0, %c0_i32 : i32, i32
  }
  func.func @transform_2(%arg0: i32) -> (i32, i32) {
    %c0_i32 = arith.constant 0 : i32
    %c0_i32_0 = arith.constant 0 : i32
    return %arg0, %c0_i32 : i32, i32
  }
  func.func @transform_3(%arg0: i32) -> (i32, i32) {
    %c0_i32 = arith.constant 0 : i32
    %c0_i32_0 = arith.constant 0 : i32
    %c0_i32_1 = arith.constant 0 : i32
    return %c0_i32, %c0_i32_0 : i32, i32
  }
  func.func @transform_4(%arg0: i32) -> (i32, i32) {
    %c0_i32 = arith.constant 0 : i32
    %c0_i32_0 = arith.constant 0 : i32
    %c0_i32_1 = arith.constant 0 : i32
    return %c0_i32, %c0_i32_0 : i32, i32
  }
  func.func @transform_5(%arg0: i32) -> (i32, i32) {
    %c0_i32 = arith.constant 0 : i32
    %c0_i32_0 = arith.constant 0 : i32
    %c0_i32_1 = arith.constant 0 : i32
    return %c0_i32, %c0_i32_0 : i32, i32
  }
  func.func @transform_6(%arg0: i32) -> (i32, i32) {
    %c0_i32 = arith.constant 0 : i32
    %c0_i32_0 = arith.constant 0 : i32
    %c0_i32_1 = arith.constant 0 : i32
    return %c0_i32, %c0_i32_0 : i32, i32
  }
  func.func @transform_7(%arg0: i32) -> (i32, i32) {
    %c0_i32 = arith.constant 0 : i32
    %c0_i32_0 = arith.constant 0 : i32
    %c0_i32_1 = arith.constant 0 : i32
    return %c0_i32, %c0_i32_0 : i32, i32
  }
  func.func @transform_8(%arg0: i32) -> (i32, i32) {
    %c0_i32 = arith.constant 0 : i32
    %c0_i32_0 = arith.constant 0 : i32
    %c0_i32_1 = arith.constant 0 : i32
    return %c0_i32, %c0_i32_0 : i32, i32
  }
  func.func @transform_9(%arg0: i32) -> (i32, i32) {
    %c0_i32 = arith.constant 0 : i32
    %c0_i32_0 = arith.constant 0 : i32
    %c0_i32_1 = arith.constant 0 : i32
    return %c0_i32, %c0_i32_0 : i32, i32
  }
  func.func @transform_10(%arg0: i32) -> (i32, i32) {
    %c0_i32 = arith.constant 0 : i32
    %c0_i32_0 = arith.constant 0 : i32
    %c0_i32_1 = arith.constant 0 : i32
    return %c0_i32, %c0_i32_0 : i32, i32
  }
  func.func @transform_11(%arg0: i32) -> (i32, i32) {
    %c0_i32 = arith.constant 0 : i32
    %c0_i32_0 = arith.constant 0 : i32
    %c0_i32_1 = arith.constant 0 : i32
    return %c0_i32, %c0_i32_0 : i32, i32
  }
  func.func @transform_12(%arg0: i32) -> (i32, i32) {
    %c0_i32 = arith.constant 0 : i32
    %c0_i32_0 = arith.constant 0 : i32
    %c0_i32_1 = arith.constant 0 : i32
    return %c0_i32, %c0_i32_0 : i32, i32
  }
  func.func @transform_13(%arg0: i32) -> (i32, i32) {
    %c0_i32 = arith.constant 0 : i32
    %c0_i32_0 = arith.constant 0 : i32
    %c0_i32_1 = arith.constant 0 : i32
    return %c0_i32, %c0_i32_0 : i32, i32
  }
  func.func @transform_14(%arg0: i32) -> (i32, i32) {
    %c0_i32 = arith.constant 0 : i32
    %c0_i32_0 = arith.constant 0 : i32
    %c0_i32_1 = arith.constant 0 : i32
    return %c0_i32, %c0_i32_0 : i32, i32
  }
  func.func @transform_15(%arg0: i32) -> (i32, i32) {
    %c0_i32 = arith.constant 0 : i32
    %c0_i32_0 = arith.constant 0 : i32
    %c0_i32_1 = arith.constant 0 : i32
    return %c0_i32, %c0_i32_0 : i32, i32
  }
  func.func @transform_16(%arg0: i32) -> (i32, i32) {
    %c0_i32 = arith.constant 0 : i32
    %c0_i32_0 = arith.constant 0 : i32
    return %arg0, %c0_i32 : i32, i32
  }
}

</mosaic_0001>

<bundles_post_ra>
// kernel: tpu_custom_call.1
= control target key start
LH: loop header
LB: loop body
LE: loop exit
PB: predicated region body
PF: predicated region fallthrough
CT: control target
= control target key end

     0   :  { %s5041_s0 = inlined_call_operand.vmem [shape: f32[16,32], index: 0, kind: input, shape index: {}]   ;;  %s5042_s1 = inlined_call_operand.vmem [shape: f32[16,16], index: 1, kind: input, shape index: {}]   ;;  %s5043_s2 = inlined_call_operand.vmem [shape: f32[16,16], index: 2, kind: input, shape index: {}]   ;;  %s5044_s3 = inlined_call_operand.vmem [shape: bf16[32,1024], index: 3, kind: input, shape index: {}]   ;;  %s5045_s4 = inlined_call_operand.vmem [shape: f32[1,512], index: 4, kind: input, shape index: {}]   ;;  %s5046_s5 = inlined_call_operand.hbm [shape: bf16[512,512], index: 5, kind: input, shape index: {}]   ;;  %s5047_s6 = inlined_call_operand.vmem [shape: f32[1,512], index: 6, kind: input, shape index: {}]   ;;  %s5048_s7 = inlined_call_operand.vmem [shape: bf16[512,16], index: 7, kind: input, shape index: {}]   ;;  %s5049_s8 = inlined_call_operand.vmem [shape: f32[1,16], index: 8, kind: input, shape index: {}]   ;;  %s5050_s9 = inlined_call_operand.vmem [shape: f32[1,512], index: 9, kind: input, shape index: {}]   ;;  %s5051_s10 = inlined_call_operand.hbm [shape: bf16[512,512], index: 10, kind: input, shape index: {}]   ;;  %s5052_s11 = inlined_call_operand.vmem [shape: f32[1,512], index: 11, kind: input, shape index: {}]   ;;  %s5053_s12 = inlined_call_operand.vmem [shape: bf16[512,32], index: 12, kind: input, shape index: {}]   ;;  %s5054_s13 = inlined_call_operand.vmem [shape: f32[1,32], index: 13, kind: input, shape index: {}]   ;;  %s5055_s14 = inlined_call_operand.vmem [shape: bf16[16,544], index: 14, kind: input, shape index: {}]   ;;  %s5056_s15 = inlined_call_operand.vmem [shape: f32[1,32], index: 15, kind: input, shape index: {}]   ;;  %s5057_s16 = inlined_call_operand.hbm [shape: f32[16,128], index: 16, kind: output, shape index: {}]  }
   0x1   :  { %5059 = sst [smem:[#allocation11_spill]] %s5041_s0 }
   0x2   :  { %21 = vsyncpa [#allocation3], 0 }
   0x3   :  { %22 = vsyncpa [#allocation6], 0 }
   0x4   :  { %23 = vsyncpa [#allocation4], 0  ;;  %s4504_s21 = smov [#allocation2]  }
   0x5   :  { %s39_s22 = sshll.u32 %s4504_s21, 4  ;;  %s40_s22 = int_to_ptr.vmem [resolvable:$true] %s39_s22 }
   0x6   :  { %s4446_s23 = scalar_lea.vmem %s40_s22, 16384  ;;  %p4451_p1 = scmp.lt.s32.totalorder %s40_s22, %s40_s22 }
   0x7   :  { %p4447_p0 = scmp.ne.s32.totalorder %s40_s22, %s4446_s23  ;;  %p4452_p2 = scmp.lt.s32.totalorder %s4446_s23, %s4446_s23 }
   0x9   :  { %p4453_p3 = por %p4452_p2, %p4451_p1 }
   0xb   :  { %p4454_p4 = pnand %p4453_p3, %p4447_p0 }
   0xd   :  { %4457 = shalt.err (!%p4454_p4)
}
   0xe   :  { %s4505_s24 = smov 256   ;;  %s4506_s25 = smov 16  }
   0xf   :  { %45 = dma.hbm_to_vmem [thread:$0]  %s5046_s5, 16384, %s40_s22, [#allocation3], %s4505_s24, %s4505_s24, %s4506_s25  }
  0x10   :  { %s4507_s28 = smov [#allocation5]  }
  0x11   :  { %s59_s29 = sshll.u32 %s4507_s28, 4  ;;  %s60_s29 = int_to_ptr.vmem [resolvable:$true] %s59_s29 }
  0x12   :  { %s4466_s30 = scalar_lea.vmem %s60_s29, 16384  ;;  %p4471_p6 = scmp.lt.s32.totalorder %s60_s29, %s60_s29 }
  0x13   :  { %p4467_p5 = scmp.ne.s32.totalorder %s60_s29, %s4466_s30  ;;  %p4472_p7 = scmp.lt.s32.totalorder %s4466_s30, %s4466_s30 }
  0x15   :  { %p4473_p8 = por %p4472_p7, %p4471_p6 }
  0x17   :  { %p4474_p9 = pnand %p4473_p8, %p4467_p5 }
  0x19   :  { %4477 = shalt.err (!%p4474_p9)
}
  0x1a   :  { %65 = dma.hbm_to_vmem [thread:$0]  %s5051_s10, 16384, %s60_s29, [#allocation6], %s4505_s24, %s4505_s24, %s4506_s25  }
  0x1b   :  { %4498 = dma.done.wait [#allocation3], 16384  }
  0x1c   :  { %4499 = vsyncadd [#allocation3], 4294950912 }
  0x1d   :  { %4500 = dma.done.wait [#allocation6], 16384  }
  0x1e   :  { %4501 = vsyncadd [#allocation6], 4294950912  ;;  %v4508_v0 = vmov 0   ;;  %v94_v1 = vld [vmem:[%s5044_s3 + $0x40] sm:$0xff]  ;;  %v95_v3 = vld [vmem:[%s5044_s3 + $0x48] sm:$0xff]  ;;  %s5060_s19 = sld [smem:[#allocation11_spill]] }
  0x1f   :  { %218 = vmatprep.mubr.bf16.mxu0 %v4508_v0  ;;  %261 = vmatprep.mubr.bf16.mxu1 %v4508_v0  ;;  %v98_v2 = vld [vmem:[%s5044_s3 + $0x60] sm:$0xff]  ;;  %v99_v5 = vld [vmem:[%s5044_s3 + $0x68] sm:$0xff]  ;;  %v96_v16 = vld [vmem:[%s5044_s3 + $0x50] sm:$0xff]  ;;  %vm182_vm0 = vcmask 261120   ;;  %vm1719_vm1 = vcmask 130048   ;;  %vm4510_vm2 = vmmov 0  }
  0x20   :  { %v3487_v4 = vcombine.high %v94_v1, %v98_v2  ;;  %v3486_v6 = vcombine.low %v94_v1, %v98_v2  ;;  %v86_v7 = vld [vmem:[%s5044_s3] sm:$0xff]  ;;  %v3489_v9 = vcombine.high %v95_v3, %v99_v5  ;;  %v3488_v10 = vcombine.low %v95_v3, %v99_v5  ;;  %v87_v12 = vld [vmem:[%s5044_s3 + $0x8] sm:$0xff]  ;;  %v100_v17 = vld [vmem:[%s5044_s3 + $0x70] sm:$0xff]  ;;  %s4512_s23 = smov 32   ;;  %s4513_s27 = smov 80  }
  0x21   :  { %v90_v8 = vld [vmem:[%s5044_s3 + $0x20] sm:$0xff]  ;;  %v91_v13 = vld [vmem:[%s5044_s3 + $0x28] sm:$0xff]  ;;  %v97_v20 = vld [vmem:[%s5044_s3 + $0x58] sm:$0xff]  ;;  %v3491_v23 = vcombine.high %v96_v16, %v100_v17  ;;  %v3490_v30 = vcombine.low %v96_v16, %v100_v17  ;;  %vm3443_vm7 = vcmask 392192   ;;  %vm3446_vm8 = vcmask 523264  }
  0x22   :  { %v3479_v11 = vcombine.high %v86_v7, %v90_v8  ;;  %198 = vmatprep.subr.bf16.mxu0 %v3487_v4  ;;  %v3481_v14 = vcombine.high %v87_v12, %v91_v13  ;;  %241 = vmatprep.subr.bf16.mxu1 %v3489_v9  ;;  %v3478_v18 = vcombine.low %v86_v7, %v90_v8  ;;  %v101_v21 = vld [vmem:[%s5044_s3 + $0x78] sm:$0xff]  ;;  %v88_v24 = vld [vmem:[%s5044_s3 + $0x10] sm:$0xff]  ;;  %vm3449_vm9 = vcmask 654336  }
  0x23   :  { %199 = vmatpush1.bf16.msra.mxu0 %v3486_v6  ;;  %242 = vmatpush1.bf16.msra.mxu1 %v3488_v10  ;;  %v3480_v22 = vcombine.low %v87_v12, %v91_v13  ;;  %v92_v25 = vld [vmem:[%s5044_s3 + $0x30] sm:$0xff]  ;;  %v3493_v26 = vcombine.high %v97_v20, %v101_v21  ;;  %v89_v27 = vld [vmem:[%s5044_s3 + $0x18] sm:$0xff]  ;;  %v3492_v31 = vcombine.low %v97_v20, %v101_v21  ;;  %vm3452_vm10 = vcmask 785408  }
  0x24   :  { %v83_v15 = vld [vmem:[%s5060_s19] sm:$0xff]  ;;  %v84_v19 = vld [vmem:[%s5060_s19 + $0x8] sm:$0xff]  ;;  %200 = vmatprep.subr.bf16.mxu0 %v3479_v11  ;;  %243 = vmatprep.subr.bf16.mxu1 %v3481_v14  ;;  %v93_v29 = vld [vmem:[%s5044_s3 + $0x38] sm:$0xff]  ;;  %v3483_v32 = vcombine.high %v88_v24, %v92_v25  ;;  %v3482_v34 = vcombine.low %v88_v24, %v92_v25  ;;  %vm3455_vm11 = vcmask 916480  }
  0x25   :  { %v85_v28 = vpack.c.bf16 %v84_v19, %v83_v15  ;;  %v3485_v33 = vcombine.high %v89_v27, %v93_v29  ;;  %v3484_v35 = vcombine.low %v89_v27, %v93_v29  ;;  %v3941_v36 = vld [vmem:[#allocation2 + $0xe4] ss:$16 sps:$4 sm:$0xff]   ;;  %v3939_v38 = vld [vmem:[#allocation2 + $0xe0] ss:$16 sps:$4 sm:$0xff]  }
  0x26   :  { %v3944_v37 = vld [vmem:[#allocation2 + $0x2e4] ss:$16 sps:$4 sm:$0xff]   ;;  %v3942_v39 = vld [vmem:[#allocation2 + $0x2e0] ss:$16 sps:$4 sm:$0xff]  }
  0x27   :  { %201 = vmatpush1.bf16.msra.mxu0 %v3478_v18  ;;  %244 = vmatpush1.bf16.msra.mxu1 %v3480_v22  ;;  %v3947_v40 = vld [vmem:[#allocation2 + $0xc4] ss:$16 sps:$4 sm:$0xff]   ;;  %v3945_v42 = vld [vmem:[#allocation2 + $0xc0] ss:$16 sps:$4 sm:$0xff]  }
  0x28   :  { %284 = vmatprep.subr.bf16.mxu0 %v3491_v23  ;;  %327 = vmatprep.subr.bf16.mxu1 %v3493_v26  ;;  %v3950_v41 = vld [vmem:[#allocation2 + $0x2c4] ss:$16 sps:$4 sm:$0xff]   ;;  %v3948_v43 = vld [vmem:[#allocation2 + $0x2c0] ss:$16 sps:$4 sm:$0xff]  }
  0x29   :  { %v3953_v44 = vld [vmem:[#allocation2 + $0xa4] ss:$16 sps:$4 sm:$0xff]   ;;  %v3951_v46 = vld [vmem:[#allocation2 + $0xa0] ss:$16 sps:$4 sm:$0xff]  }
  0x2a   :  { %3494 = vmatmul.mubr.msk.bf16.vlgmr.msra.gmra.mxu0 %vm182_vm0, %v85_v28  ;;  %3495 = vmatmul.mubr.msk.bf16.vlgmr.msra.gmra.mxu1 %vm182_vm0, %v85_v28  ;;  %v3956_v45 = vld [vmem:[#allocation2 + $0x2a4] ss:$16 sps:$4 sm:$0xff]   ;;  %v3954_v47 = vld [vmem:[#allocation2 + $0x2a0] ss:$16 sps:$4 sm:$0xff]  }
  0x2b   :  { %285 = vmatpush1.bf16.msra.mxu0 %v3490_v30  ;;  %328 = vmatpush1.bf16.msra.mxu1 %v3492_v31  ;;  %v3959_v48 = vld [vmem:[#allocation2 + $0x84] ss:$16 sps:$4 sm:$0xff]   ;;  %v3957_v50 = vld [vmem:[#allocation2 + $0x80] ss:$16 sps:$4 sm:$0xff]  }
  0x2c   :  { %286 = vmatprep.subr.bf16.mxu0 %v3483_v32  ;;  %329 = vmatprep.subr.bf16.mxu1 %v3485_v33  ;;  %v3962_v49 = vld [vmem:[#allocation2 + $0x284] ss:$16 sps:$4 sm:$0xff]   ;;  %v3960_v51 = vld [vmem:[#allocation2 + $0x280] ss:$16 sps:$4 sm:$0xff]  }
  0x2d   :  { %304 = vmatprep.mubr.bf16.mxu0 %v4508_v0  ;;  %347 = vmatprep.mubr.bf16.mxu1 %v4508_v0  ;;  %v3965_v52 = vld [vmem:[#allocation2 + $0x64] ss:$16 sps:$4 sm:$0xff]   ;;  %v3963_v54 = vld [vmem:[#allocation2 + $0x60] ss:$16 sps:$4 sm:$0xff]  }
  0x2e   :  { %v3968_v53 = vld [vmem:[#allocation2 + $0x264] ss:$16 sps:$4 sm:$0xff]   ;;  %v3966_v55 = vld [vmem:[#allocation2 + $0x260] ss:$16 sps:$4 sm:$0xff]  }
  0x2f   :  { %287 = vmatpush1.bf16.msra.mxu0 %v3482_v34  ;;  %330 = vmatpush1.bf16.msra.mxu1 %v3484_v35  ;;  %v3971_v56 = vld [vmem:[#allocation2 + $0x44] ss:$16 sps:$4 sm:$0xff]   ;;  %v3969_v58 = vld [vmem:[#allocation2 + $0x40] ss:$16 sps:$4 sm:$0xff]  }
  0x30   :  { %1190 = vmatprep.subr.bf16.mxu0 %v3941_v36  ;;  %1233 = vmatprep.subr.bf16.mxu1 %v3944_v37  ;;  %v3974_v57 = vld [vmem:[#allocation2 + $0x244] ss:$16 sps:$4 sm:$0xff]   ;;  %v3972_v59 = vld [vmem:[#allocation2 + $0x240] ss:$16 sps:$4 sm:$0xff]   ;;  %v4037_v37 = vld [vmem:[#allocation2 + $0xec] ss:$16 sps:$4 sm:$0xff]  }
  0x31   :  { %v3977_v60 = vld [vmem:[#allocation2 + $0x24] ss:$16 sps:$4 sm:$0xff]   ;;  %v3975_v61 = vld [vmem:[#allocation2 + $0x20] ss:$16 sps:$4 sm:$0xff]  }
  0x32   :  { %3496 = vmatmul.mubr.msk.bf16.vlgmr.msra.gmra.mxu0 %vm182_vm0, %v85_v28  ;;  %3497 = vmatmul.mubr.msk.bf16.vlgmr.msra.gmra.mxu1 %vm182_vm0, %v85_v28  ;;  %v3980_v62 = vld [vmem:[#allocation2 + $0x224] ss:$16 sps:$4 sm:$0xff]   ;;  %v3978_v63 = vld [vmem:[#allocation2 + $0x220] ss:$16 sps:$4 sm:$0xff]  }
  0x33   :  { %1191 = vmatpush1.bf16.msra.mxu0 %v3939_v38  ;;  %1234 = vmatpush1.bf16.msra.mxu1 %v3942_v39  ;;  %v3983_v1 = vld [vmem:[#allocation2 + $0x4] ss:$16 sps:$4 sm:$0xff]   ;;  %v3981_v3 = vld [vmem:[#allocation2] ss:$16 sps:$4 sm:$0xff]   ;;  %v4040_v38 = vld [vmem:[#allocation2 + $0x2ec] ss:$16 sps:$4 sm:$0xff]   ;;  %v360_v39 = vlaneseq }
  0x34   :  { %1192 = vmatprep.subr.bf16.mxu0 %v3947_v40  ;;  %1235 = vmatprep.subr.bf16.mxu1 %v3950_v41  ;;  %v3986_v2 = vld [vmem:[#allocation2 + $0x204] ss:$16 sps:$4 sm:$0xff]   ;;  %v3984_v4 = vld [vmem:[#allocation2 + $0x200] ss:$16 sps:$4 sm:$0xff]  }
  0x35   :  { %v3989_v5 = vld [vmem:[#allocation2 + $0x1e4] ss:$16 sps:$4 sm:$0xff]   ;;  %v3987_v7 = vld [vmem:[#allocation2 + $0x1e0] ss:$16 sps:$4 sm:$0xff]   ;;  %v361_v40 = vshrl.u32 %v360_v39, 7 }
  0x36   :  { %v3992_v6 = vld [vmem:[#allocation2 + $0x3e4] ss:$16 sps:$4 sm:$0xff]   ;;  %v3990_v8 = vld [vmem:[#allocation2 + $0x3e0] ss:$16 sps:$4 sm:$0xff]   ;;  %v4071_v39 = vld [vmem:[#allocation2 + $0x28] ss:$16 sps:$4 sm:$0xff]  }
  0x37   :  { %1193 = vmatpush1.bf16.msra.mxu0 %v3945_v42  ;;  %1236 = vmatpush1.bf16.msra.mxu1 %v3948_v43  ;;  %v3995_v9 = vld [vmem:[#allocation2 + $0x1c4] ss:$16 sps:$4 sm:$0xff]   ;;  %v3993_v11 = vld [vmem:[#allocation2 + $0x1c0] ss:$16 sps:$4 sm:$0xff]   ;;  %v4673_v41 = vsub.s32 1, %v361_v40  ;;  %v4675_v42 = vsub.s32 0, %v361_v40 }
  0x38   :  { %1194 = vmatprep.subr.bf16.mxu0 %v3953_v44  ;;  %1237 = vmatprep.subr.bf16.mxu1 %v3956_v45  ;;  %v3998_v10 = vld [vmem:[#allocation2 + $0x3c4] ss:$16 sps:$4 sm:$0xff]   ;;  %v3996_v12 = vld [vmem:[#allocation2 + $0x3c0] ss:$16 sps:$4 sm:$0xff]   ;;  %v4677_v43 = vsub.s32 3, %v361_v40  ;;  %v4682_v45 = vsub.s32 2, %v361_v40 }
  0x39   :  { %v4001_v13 = vld [vmem:[#allocation2 + $0x1a4] ss:$16 sps:$4 sm:$0xff]   ;;  %v3999_v15 = vld [vmem:[#allocation2 + $0x1a0] ss:$16 sps:$4 sm:$0xff]   ;;  %v4074_v40 = vld [vmem:[#allocation2 + $0x228] ss:$16 sps:$4 sm:$0xff]  }
  0x3a   :  { %v4004_v14 = vld [vmem:[#allocation2 + $0x3a4] ss:$16 sps:$4 sm:$0xff]   ;;  %v4002_v16 = vld [vmem:[#allocation2 + $0x3a0] ss:$16 sps:$4 sm:$0xff]  }
  0x3b   :  { %1195 = vmatpush1.bf16.msra.mxu0 %v3951_v46  ;;  %1238 = vmatpush1.bf16.msra.mxu1 %v3954_v47  ;;  %v4007_v17 = vld [vmem:[#allocation2 + $0x184] ss:$16 sps:$4 sm:$0xff]   ;;  %v4005_v19 = vld [vmem:[#allocation2 + $0x180] ss:$16 sps:$4 sm:$0xff]  }
  0x3c   :  { %1196 = vmatprep.subr.bf16.mxu0 %v3959_v48  ;;  %1239 = vmatprep.subr.bf16.mxu1 %v3962_v49  ;;  %v4010_v18 = vld [vmem:[#allocation2 + $0x384] ss:$16 sps:$4 sm:$0xff]   ;;  %v4008_v20 = vld [vmem:[#allocation2 + $0x380] ss:$16 sps:$4 sm:$0xff]  }
  0x3d   :  { %v4013_v21 = vld [vmem:[#allocation2 + $0x164] ss:$16 sps:$4 sm:$0xff]   ;;  %v4011_v23 = vld [vmem:[#allocation2 + $0x160] ss:$16 sps:$4 sm:$0xff]  }
  0x3e   :  { %v4016_v22 = vld [vmem:[#allocation2 + $0x364] ss:$16 sps:$4 sm:$0xff]   ;;  %v4014_v24 = vld [vmem:[#allocation2 + $0x360] ss:$16 sps:$4 sm:$0xff]  }
  0x3f   :  { %1197 = vmatpush1.bf16.msra.mxu0 %v3957_v50  ;;  %1240 = vmatpush1.bf16.msra.mxu1 %v3960_v51  ;;  %v4019_v25 = vld [vmem:[#allocation2 + $0x144] ss:$16 sps:$4 sm:$0xff]   ;;  %v4017_v27 = vld [vmem:[#allocation2 + $0x140] ss:$16 sps:$4 sm:$0xff]  }
  0x40   :  { %1198 = vmatprep.subr.bf16.mxu0 %v3965_v52  ;;  %1241 = vmatprep.subr.bf16.mxu1 %v3968_v53  ;;  %v4022_v26 = vld [vmem:[#allocation2 + $0x344] ss:$16 sps:$4 sm:$0xff]   ;;  %v4020_v28 = vld [vmem:[#allocation2 + $0x340] ss:$16 sps:$4 sm:$0xff]  }
  0x41   :  { %v4025_v29 = vld [vmem:[#allocation2 + $0x124] ss:$16 sps:$4 sm:$0xff]   ;;  %v4023_v31 = vld [vmem:[#allocation2 + $0x120] ss:$16 sps:$4 sm:$0xff]  }
  0x42   :  { %v4028_v30 = vld [vmem:[#allocation2 + $0x324] ss:$16 sps:$4 sm:$0xff]   ;;  %v4026_v32 = vld [vmem:[#allocation2 + $0x320] ss:$16 sps:$4 sm:$0xff]  }
  0x43   :  { %1199 = vmatpush1.bf16.msra.mxu0 %v3963_v54  ;;  %1242 = vmatpush1.bf16.msra.mxu1 %v3966_v55  ;;  %v4031_v33 = vld [vmem:[#allocation2 + $0x104] ss:$16 sps:$4 sm:$0xff]   ;;  %v4029_v35 = vld [vmem:[#allocation2 + $0x100] ss:$16 sps:$4 sm:$0xff]  }
  0x44   :  { %1200 = vmatprep.subr.bf16.mxu0 %v3971_v56  ;;  %1243 = vmatprep.subr.bf16.mxu1 %v3974_v57  ;;  %v4034_v34 = vld [vmem:[#allocation2 + $0x304] ss:$16 sps:$4 sm:$0xff]   ;;  %v4032_v36 = vld [vmem:[#allocation2 + $0x300] ss:$16 sps:$4 sm:$0xff]  }
  0x45   :  { %v358_v44 = vld [vmem:[%s5045_s4] sm:$0xf] }
  0x46   :  { %v367_v48 = vrot.slane %v358_v44, %v4673_v41  ;;  %v363_v49 = vrot.slane %v358_v44, %v4675_v42  ;;  %v375_v51 = vrot.slane %v358_v44, %v4677_v43  ;;  %v371_v52 = vrot.slane %v358_v44, %v4682_v45  ;;  %v4079_v44 = vld [vmem:[#allocation2 + $0xc] ss:$16 sps:$4 sm:$0xff]  }
  0x47   :  { %1201 = vmatpush1.bf16.msra.mxu0 %v3969_v58  ;;  %1244 = vmatpush1.bf16.msra.mxu1 %v3972_v59 }
  0x48   :  { %1202 = vmatprep.subr.bf16.mxu0 %v3977_v60  ;;  %1245 = vmatprep.subr.bf16.mxu1 %v3980_v62 }
  0x4b   :  { %1203 = vmatpush1.bf16.msra.mxu0 %v3975_v61  ;;  %1246 = vmatpush1.bf16.msra.mxu1 %v3978_v63 }
  0x4c   :  { %1204 = vmatprep.subr.bf16.mxu0 %v3983_v1  ;;  %1247 = vmatprep.subr.bf16.mxu1 %v3986_v2 }
  0x4f   :  { %1205 = vmatpush1.bf16.msra.mxu0 %v3981_v3  ;;  %1248 = vmatpush1.bf16.msra.mxu1 %v3984_v4 }
  0x50   :  { %1206 = vmatprep.subr.bf16.mxu0 %v3989_v5  ;;  %1249 = vmatprep.subr.bf16.mxu1 %v3992_v6 }
  0x53   :  { %1207 = vmatpush2.bf16.msra.mxu0 %v3987_v7  ;;  %1250 = vmatpush2.bf16.msra.mxu1 %v3990_v8 }
  0x54   :  { %1208 = vmatprep.subr.bf16.mxu0 %v3995_v9  ;;  %1251 = vmatprep.subr.bf16.mxu1 %v3998_v10 }
  0x57   :  { %1209 = vmatpush2.bf16.msra.mxu0 %v3993_v11  ;;  %1252 = vmatpush2.bf16.msra.mxu1 %v3996_v12  ;;  %v4035_v12 = vld [vmem:[#allocation2 + $0xe8] ss:$16 sps:$4 sm:$0xff]  }
  0x58   :  { %1210 = vmatprep.subr.bf16.mxu0 %v4001_v13  ;;  %1253 = vmatprep.subr.bf16.mxu1 %v4004_v14 }
  0x5b   :  { %1211 = vmatpush2.bf16.msra.mxu0 %v3999_v15  ;;  %1254 = vmatpush2.bf16.msra.mxu1 %v4002_v16  ;;  %v4038_v15 = vld [vmem:[#allocation2 + $0x2e8] ss:$16 sps:$4 sm:$0xff]  }
  0x5c   :  { %1212 = vmatprep.subr.bf16.mxu0 %v4007_v17  ;;  %1255 = vmatprep.subr.bf16.mxu1 %v4010_v18  ;;  %v4043_v17 = vld [vmem:[#allocation2 + $0xcc] ss:$16 sps:$4 sm:$0xff]  }
  0x5d   :  { %v4046_v18 = vld [vmem:[#allocation2 + $0x2cc] ss:$16 sps:$4 sm:$0xff]  }
  0x5f   :  { %1213 = vmatpush2.bf16.msra.mxu0 %v4005_v19  ;;  %1256 = vmatpush2.bf16.msra.mxu1 %v4008_v20  ;;  %v4041_v19 = vld [vmem:[#allocation2 + $0xc8] ss:$16 sps:$4 sm:$0xff]  }
  0x60   :  { %1214 = vmatprep.subr.bf16.mxu0 %v4013_v21  ;;  %1257 = vmatprep.subr.bf16.mxu1 %v4016_v22  ;;  %v4044_v20 = vld [vmem:[#allocation2 + $0x2c8] ss:$16 sps:$4 sm:$0xff]   ;;  %v4049_v21 = vld [vmem:[#allocation2 + $0xac] ss:$16 sps:$4 sm:$0xff]  }
  0x61   :  { %v4052_v22 = vld [vmem:[#allocation2 + $0x2ac] ss:$16 sps:$4 sm:$0xff]  }
  0x63   :  { %1215 = vmatpush2.bf16.msra.mxu0 %v4011_v23  ;;  %1258 = vmatpush2.bf16.msra.mxu1 %v4014_v24  ;;  %v4047_v23 = vld [vmem:[#allocation2 + $0xa8] ss:$16 sps:$4 sm:$0xff]  }
  0x64   :  { %1216 = vmatprep.subr.bf16.mxu0 %v4019_v25  ;;  %1259 = vmatprep.subr.bf16.mxu1 %v4022_v26  ;;  %v4050_v24 = vld [vmem:[#allocation2 + $0x2a8] ss:$16 sps:$4 sm:$0xff]   ;;  %v4055_v25 = vld [vmem:[#allocation2 + $0x8c] ss:$16 sps:$4 sm:$0xff]  }
  0x65   :  { %v4058_v26 = vld [vmem:[#allocation2 + $0x28c] ss:$16 sps:$4 sm:$0xff]  }
  0x67   :  { %1217 = vmatpush2.bf16.msra.mxu0 %v4017_v27  ;;  %1260 = vmatpush2.bf16.msra.mxu1 %v4020_v28  ;;  %v4053_v27 = vld [vmem:[#allocation2 + $0x88] ss:$16 sps:$4 sm:$0xff]  }
  0x68   :  { %1218 = vmatprep.subr.bf16.mxu0 %v4025_v29  ;;  %1261 = vmatprep.subr.bf16.mxu1 %v4028_v30  ;;  %v4056_v28 = vld [vmem:[#allocation2 + $0x288] ss:$16 sps:$4 sm:$0xff]   ;;  %v4061_v29 = vld [vmem:[#allocation2 + $0x6c] ss:$16 sps:$4 sm:$0xff]  }
  0x69   :  { %v4064_v30 = vld [vmem:[#allocation2 + $0x26c] ss:$16 sps:$4 sm:$0xff]  }
  0x6b   :  { %1219 = vmatpush2.bf16.msra.mxu0 %v4023_v31  ;;  %1262 = vmatpush2.bf16.msra.mxu1 %v4026_v32  ;;  %v4059_v31 = vld [vmem:[#allocation2 + $0x68] ss:$16 sps:$4 sm:$0xff]  }
  0x6c   :  { %1220 = vmatprep.subr.bf16.mxu0 %v4031_v33  ;;  %1263 = vmatprep.subr.bf16.mxu1 %v4034_v34  ;;  %v4062_v32 = vld [vmem:[#allocation2 + $0x268] ss:$16 sps:$4 sm:$0xff]   ;;  %v4067_v33 = vld [vmem:[#allocation2 + $0x4c] ss:$16 sps:$4 sm:$0xff]  }
  0x6d   :  { %v4070_v34 = vld [vmem:[#allocation2 + $0x24c] ss:$16 sps:$4 sm:$0xff]  }
  0x6f   :  { %1221 = vmatpush2.bf16.msra.mxu0 %v4029_v35  ;;  %1264 = vmatpush2.bf16.msra.mxu1 %v4032_v36  ;;  %v4065_v35 = vld [vmem:[#allocation2 + $0x48] ss:$16 sps:$4 sm:$0xff]  }
  0x70   :  { %1276 = vmatprep.subr.bf16.mxu0 %v4037_v37  ;;  %1319 = vmatprep.subr.bf16.mxu1 %v4040_v38  ;;  %v4068_v36 = vld [vmem:[#allocation2 + $0x248] ss:$16 sps:$4 sm:$0xff]   ;;  %v4073_v37 = vld [vmem:[#allocation2 + $0x2c] ss:$16 sps:$4 sm:$0xff]  }
  0x71   :  { %v4076_v38 = vld [vmem:[#allocation2 + $0x22c] ss:$16 sps:$4 sm:$0xff]  }
  0xea   :  { %v220_v46 = vpop.f32.mrf.mxu0  ;;  %v263_v47 = vpop.f32.mrf.mxu1 }
  0xeb   :  { %v380_v58 = vadd.f32 %v363_v49, %v220_v46  ;;  %v382_v62 = vadd.f32 %v371_v52, %v263_v47  ;;  %v4082_v46 = vld [vmem:[#allocation2 + $0x20c] ss:$16 sps:$4 sm:$0xff]   ;;  %v4077_v47 = vld [vmem:[#allocation2 + $0x8] ss:$16 sps:$4 sm:$0xff]  }
  0xec   :  { %v222_v50 = vpop.f32.mrf.mxu0  ;;  %v265_v53 = vpop.f32.mrf.mxu1 }
  0xed   :  { %v381_v55 = vadd.f32 %v367_v48, %v222_v50  ;;  %v383_v59 = vadd.f32 %v375_v51, %v265_v53  ;;  %v388_v7 = vmax.f32 %v380_v58, 0.0  ;;  %v390_v10 = vmax.f32 %v382_v62, 0.0  ;;  %v4088_v50 = vld [vmem:[#allocation2 + $0x3ec] ss:$16 sps:$4 sm:$0xff]  }
  0xee   :  { %v224_v54 = vpop.f32.mrf.mxu0  ;;  %v267_v57 = vpop.f32.mrf.mxu1  ;;  %v4091_v53 = vld [vmem:[#allocation2 + $0x1cc] ss:$16 sps:$4 sm:$0xff]  }
  0xef   :  { %v384_v56 = vadd.f32 %v363_v49, %v224_v54  ;;  %v386_v60 = vadd.f32 %v371_v52, %v267_v57  ;;  %v389_v4 = vmax.f32 %v381_v55, 0.0  ;;  %v391_v8 = vmax.f32 %v383_v59, 0.0  ;;  %v4085_v49 = vld [vmem:[#allocation2 + $0x1ec] ss:$16 sps:$4 sm:$0xff]   ;;  %v4086_v52 = vld [vmem:[#allocation2 + $0x3e8] ss:$16 sps:$4 sm:$0xff]  }
  0xf0   :  { %v226_v61 = vpop.f32.mrf.mxu0  ;;  %v269_v1 = vpop.f32.mrf.mxu1  ;;  %v4094_v54 = vld [vmem:[#allocation2 + $0x3cc] ss:$16 sps:$4 sm:$0xff]   ;;  %v4089_v55 = vld [vmem:[#allocation2 + $0x1c8] ss:$16 sps:$4 sm:$0xff]  }
  0xf1   :  { %v385_v63 = vadd.f32 %v367_v48, %v226_v61  ;;  %v392_v2 = vmax.f32 %v384_v56, 0.0  ;;  %v387_v3 = vadd.f32 %v375_v51, %v269_v1  ;;  %v394_v5 = vmax.f32 %v386_v60, 0.0  ;;  %v4080_v48 = vld [vmem:[#allocation2 + $0x208] ss:$16 sps:$4 sm:$0xff]   ;;  %v4097_v57 = vld [vmem:[#allocation2 + $0x1ac] ss:$16 sps:$4 sm:$0xff]  }
  0xf2   :  { %v4083_v51 = vld [vmem:[#allocation2 + $0x1e8] ss:$16 sps:$4 sm:$0xff]   ;;  %v4100_v58 = vld [vmem:[#allocation2 + $0x3ac] ss:$16 sps:$4 sm:$0xff]  }
  0xf3   :  { %v393_v6 = vmax.f32 %v385_v63, 0.0  ;;  %v395_v9 = vmax.f32 %v387_v3, 0.0  ;;  %v4688_v13 = vpack.c.bf16 %v392_v2, %v388_v7  ;;  %v4690_v16 = vpack.c.bf16 %v394_v5, %v390_v10  ;;  %v4092_v56 = vld [vmem:[#allocation2 + $0x3c8] ss:$16 sps:$4 sm:$0xff]   ;;  %v4103_v61 = vld [vmem:[#allocation2 + $0x18c] ss:$16 sps:$4 sm:$0xff]  }
  0xf4   :  { %v4095_v59 = vld [vmem:[#allocation2 + $0x1a8] ss:$16 sps:$4 sm:$0xff]   ;;  %v4106_v62 = vld [vmem:[#allocation2 + $0x38c] ss:$16 sps:$4 sm:$0xff]  }
  0xf5   :  { %v397_v11 = vpack.c.bf16 %v393_v6, %v389_v4  ;;  %v399_v14 = vpack.c.bf16 %v395_v9, %v391_v8  ;;  %v4098_v60 = vld [vmem:[#allocation2 + $0x3a8] ss:$16 sps:$4 sm:$0xff]   ;;  %v4109_v2 = vld [vmem:[#allocation2 + $0x16c] ss:$16 sps:$4 sm:$0xff]  }
  0xf6   :  { %v4101_v63 = vld [vmem:[#allocation2 + $0x188] ss:$16 sps:$4 sm:$0xff]   ;;  %v4112_v3 = vld [vmem:[#allocation2 + $0x36c] ss:$16 sps:$4 sm:$0xff]  }
  0xf7   :  { %1222 = vmatprep.mubr.bf16.mxu0 %v397_v11  ;;  %1265 = vmatprep.mubr.bf16.mxu1 %v399_v14  ;;  %v4104_v1 = vld [vmem:[#allocation2 + $0x388] ss:$16 sps:$4 sm:$0xff]   ;;  %v4115_v6 = vld [vmem:[#allocation2 + $0x14c] ss:$16 sps:$4 sm:$0xff]  }
  0xf8   :  { %1223 = vmatmul.mubr.bf16.vlgmr.msra.gmra.mxu0 %v4688_v13  ;;  %1266 = vmatmul.mubr.bf16.vlgmr.msra.gmra.mxu1 %v4690_v16  ;;  %v4107_v4 = vld [vmem:[#allocation2 + $0x168] ss:$16 sps:$4 sm:$0xff]   ;;  %v4118_v7 = vld [vmem:[#allocation2 + $0x34c] ss:$16 sps:$4 sm:$0xff]  }
  0xf9   :  { %1277 = vmatpush1.bf16.msra.mxu0 %v4035_v12  ;;  %1320 = vmatpush1.bf16.msra.mxu1 %v4038_v15  ;;  %v4110_v5 = vld [vmem:[#allocation2 + $0x368] ss:$16 sps:$4 sm:$0xff]   ;;  %v4121_v10 = vld [vmem:[#allocation2 + $0x12c] ss:$16 sps:$4 sm:$0xff]  }
  0xfa   :  { %1308 = vmatprep.mubr.bf16.mxu0 %v397_v11  ;;  %1351 = vmatprep.mubr.bf16.mxu1 %v399_v14  ;;  %v4113_v8 = vld [vmem:[#allocation2 + $0x148] ss:$16 sps:$4 sm:$0xff]   ;;  %v4124_v11 = vld [vmem:[#allocation2 + $0x32c] ss:$16 sps:$4 sm:$0xff]  }
  0xfb   :  { %1278 = vmatprep.subr.bf16.mxu0 %v4043_v17  ;;  %1321 = vmatprep.subr.bf16.mxu1 %v4046_v18  ;;  %v4116_v9 = vld [vmem:[#allocation2 + $0x348] ss:$16 sps:$4 sm:$0xff]   ;;  %v4127_v15 = vld [vmem:[#allocation2 + $0x10c] ss:$16 sps:$4 sm:$0xff]  }
  0xfc   :  { %v4119_v12 = vld [vmem:[#allocation2 + $0x128] ss:$16 sps:$4 sm:$0xff]   ;;  %v4130_v17 = vld [vmem:[#allocation2 + $0x30c] ss:$16 sps:$4 sm:$0xff]  }
  0xfd   :  { %1279 = vmatpush1.bf16.msra.mxu0 %v4041_v19  ;;  %1322 = vmatpush1.bf16.msra.mxu1 %v4044_v20  ;;  %v4122_v14 = vld [vmem:[#allocation2 + $0x328] ss:$16 sps:$4 sm:$0xff]  }
  0xfe   :  { %1280 = vmatprep.subr.bf16.mxu0 %v4049_v21  ;;  %1323 = vmatprep.subr.bf16.mxu1 %v4052_v22  ;;  %v4125_v18 = vld [vmem:[#allocation2 + $0x108] ss:$16 sps:$4 sm:$0xff]   ;;  %v4133_v22 = vld [vmem:[%s5048_s7 + $0x70] sm:$0xff]  }
  0xff   :  { %v4128_v19 = vld [vmem:[#allocation2 + $0x308] ss:$16 sps:$4 sm:$0xff]  }
 0x100   :  { %v4131_v20 = vld [vmem:[%s5048_s7 + $0x78] sm:$0xff]  }
 0x101   :  { %1281 = vmatpush1.bf16.msra.mxu0 %v4047_v23  ;;  %1324 = vmatpush1.bf16.msra.mxu1 %v4050_v24  ;;  %v4132_v21 = vld [vmem:[%s5048_s7 + $0x38] sm:$0xff]   ;;  %v4134_v23 = vld [vmem:[%s5048_s7 + $0x30] sm:$0xff]   ;;  %v4135_v24 = vld [vmem:[%s5048_s7 + $0x68] sm:$0xff]  }
 0x102   :  { %1282 = vmatprep.subr.bf16.mxu0 %v4055_v25  ;;  %1325 = vmatprep.subr.bf16.mxu1 %v4058_v26  ;;  %v4136_v25 = vld [vmem:[%s5048_s7 + $0x28] sm:$0xff]   ;;  %v4139_v26 = vld [vmem:[%s5048_s7 + $0x58] sm:$0xff]  }
 0x105   :  { %1283 = vmatpush1.bf16.msra.mxu0 %v4053_v27  ;;  %1326 = vmatpush1.bf16.msra.mxu1 %v4056_v28  ;;  %v4140_v27 = vld [vmem:[%s5048_s7 + $0x18] sm:$0xff]   ;;  %v4141_v28 = vld [vmem:[%s5048_s7 + $0x50] sm:$0xff]  }
 0x106   :  { %1284 = vmatprep.subr.bf16.mxu0 %v4061_v29  ;;  %1327 = vmatprep.subr.bf16.mxu1 %v4064_v30  ;;  %v4147_v29 = vld [vmem:[%s5048_s7 + $0xf8] sm:$0xff]  }
 0x107   :  { %v4148_v30 = vld [vmem:[%s5048_s7 + $0xb8] sm:$0xff]  }
 0x109   :  { %1285 = vmatpush1.bf16.msra.mxu0 %v4059_v31  ;;  %1328 = vmatpush1.bf16.msra.mxu1 %v4062_v32  ;;  %v4149_v31 = vld [vmem:[%s5048_s7 + $0xf0] sm:$0xff]  }
 0x10a   :  { %1286 = vmatprep.subr.bf16.mxu0 %v4067_v33  ;;  %1329 = vmatprep.subr.bf16.mxu1 %v4070_v34  ;;  %v4142_v32 = vld [vmem:[%s5048_s7 + $0x10] sm:$0xff]   ;;  %v4143_v33 = vld [vmem:[%s5048_s7 + $0x48] sm:$0xff]  }
 0x10b   :  { %v4150_v34 = vld [vmem:[%s5048_s7 + $0xb0] sm:$0xff]  }
 0x10d   :  { %1287 = vmatpush1.bf16.msra.mxu0 %v4065_v35  ;;  %1330 = vmatpush1.bf16.msra.mxu1 %v4068_v36  ;;  %v4151_v35 = vld [vmem:[%s5048_s7 + $0xe8] sm:$0xff]  }
 0x10e   :  { %1288 = vmatprep.subr.bf16.mxu0 %v4073_v37  ;;  %1331 = vmatprep.subr.bf16.mxu1 %v4076_v38  ;;  %v4144_v36 = vld [vmem:[%s5048_s7 + $0x8] sm:$0xff]   ;;  %v4145_v37 = vld [vmem:[%s5048_s7 + $0x40] sm:$0xff]  }
 0x10f   :  { %v4152_v38 = vld [vmem:[%s5048_s7 + $0xa8] sm:$0xff]  }
 0x111   :  { %1289 = vmatpush1.bf16.msra.mxu0 %v4071_v39  ;;  %1332 = vmatpush1.bf16.msra.mxu1 %v4074_v40  ;;  %v4153_v39 = vld [vmem:[%s5048_s7 + $0xe0] sm:$0xff]  }
 0x112   :  { %1290 = vmatprep.subr.bf16.mxu0 %v4079_v44  ;;  %1333 = vmatprep.subr.bf16.mxu1 %v4082_v46  ;;  %v4146_v40 = vld [vmem:[%s5048_s7] sm:$0xff]   ;;  %v4155_v46 = vld [vmem:[%s5048_s7 + $0xd8] sm:$0xff]  }
 0x113   :  { %v4154_v44 = vld [vmem:[%s5048_s7 + $0xa0] sm:$0xff]  }
 0x115   :  { %1291 = vmatpush1.bf16.msra.mxu0 %v4077_v47  ;;  %1334 = vmatpush1.bf16.msra.mxu1 %v4080_v48  ;;  %v4156_v47 = vld [vmem:[%s5048_s7 + $0x98] sm:$0xff]   ;;  %v4157_v48 = vld [vmem:[%s5048_s7 + $0xd0] sm:$0xff]  }
 0x116   :  { %1292 = vmatprep.subr.bf16.mxu0 %v4085_v49  ;;  %1335 = vmatprep.subr.bf16.mxu1 %v4088_v50  ;;  %v4158_v49 = vld [vmem:[%s5048_s7 + $0x90] sm:$0xff]   ;;  %v4159_v50 = vld [vmem:[%s5048_s7 + $0xc8] sm:$0xff]  }
 0x119   :  { %1293 = vmatpush2.bf16.msra.mxu0 %v4083_v51  ;;  %1336 = vmatpush2.bf16.msra.mxu1 %v4086_v52  ;;  %v4160_v51 = vld [vmem:[%s5048_s7 + $0x88] sm:$0xff]   ;;  %v4161_v52 = vld [vmem:[%s5048_s7 + $0xc0] sm:$0xff]  }
 0x11a   :  { %1294 = vmatprep.subr.bf16.mxu0 %v4091_v53  ;;  %1337 = vmatprep.subr.bf16.mxu1 %v4094_v54  ;;  %v4162_v53 = vld [vmem:[%s5048_s7 + $0x80] sm:$0xff]   ;;  %v4792_v54 = vpop.f32.mrf.mxu0 }
 0x11d   :  { %1295 = vmatpush2.bf16.msra.mxu0 %v4089_v55  ;;  %1338 = vmatpush2.bf16.msra.mxu1 %v4092_v56  ;;  %v4794_v55 = vpop.f32.mrf.mxu1  ;;  %v4796_v56 = vpop.f32.mrf.mxu0 }
 0x11e   :  { %1296 = vmatprep.subr.bf16.mxu0 %v4097_v57  ;;  %1339 = vmatprep.subr.bf16.mxu1 %v4100_v58 }
 0x11f   :  { %v4798_v57 = vpop.f32.mrf.mxu1  ;;  %v4800_v58 = vpop.f32.mrf.mxu0 }
 0x121   :  { %1297 = vmatpush2.bf16.msra.mxu0 %v4095_v59  ;;  %1340 = vmatpush2.bf16.msra.mxu1 %v4098_v60  ;;  %v4802_v59 = vpop.f32.mrf.mxu1  ;;  %v528_v60 = vld [vmem:[%s5047_s6] sm:$0xf] }
 0x122   :  { %1298 = vmatprep.subr.bf16.mxu0 %v4103_v61  ;;  %1341 = vmatprep.subr.bf16.mxu1 %v4106_v62  ;;  %v4807_v61 = vpop.f32.mrf.mxu0 }
 0x123   :  { %v4809_v62 = vpop.f32.mrf.mxu1 }
 0x125   :  { %1299 = vmatpush2.bf16.msra.mxu0 %v4101_v63  ;;  %1342 = vmatpush2.bf16.msra.mxu1 %v4104_v1  ;;  %v537_v63 = vrot.slane %v528_v60, %v4673_v41  ;;  %v533_v1 = vrot.slane %v528_v60, %v4675_v42 }
 0x126   :  { %1300 = vmatprep.subr.bf16.mxu0 %v4109_v2  ;;  %1343 = vmatprep.subr.bf16.mxu1 %v4112_v3 }
 0x129   :  { %1301 = vmatpush2.bf16.msra.mxu0 %v4107_v4  ;;  %1344 = vmatpush2.bf16.msra.mxu1 %v4110_v5 }
 0x12a   :  { %1302 = vmatprep.subr.bf16.mxu0 %v4115_v6  ;;  %1345 = vmatprep.subr.bf16.mxu1 %v4118_v7 }
 0x12d   :  { %1303 = vmatpush2.bf16.msra.mxu0 %v4113_v8  ;;  %1346 = vmatpush2.bf16.msra.mxu1 %v4116_v9 }
 0x12e   :  { %1304 = vmatprep.subr.bf16.mxu0 %v4121_v10  ;;  %1347 = vmatprep.subr.bf16.mxu1 %v4124_v11 }
 0x131   :  { %1305 = vmatpush2.bf16.msra.mxu0 %v4119_v12  ;;  %1348 = vmatpush2.bf16.msra.mxu1 %v4122_v14 }
 0x132   :  { %1306 = vmatprep.subr.bf16.mxu0 %v4127_v15  ;;  %1349 = vmatprep.subr.bf16.mxu1 %v4130_v17 }
 0x135   :  { %1307 = vmatpush2.bf16.msra.mxu0 %v4125_v18  ;;  %1350 = vmatpush2.bf16.msra.mxu1 %v4128_v19 }
 0x136   :  { %3829 = vmatprep.subr.bf16.mxu0 %v4131_v20  ;;  %3851 = vmatprep.subr.bf16.mxu1 %v4147_v29 }
 0x138   :  { %1309 = vmatmul.mubr.bf16.vlgmr.msra.gmra.mxu0 %v4688_v13  ;;  %1352 = vmatmul.mubr.bf16.vlgmr.msra.gmra.mxu1 %v4690_v16  ;;  %v4137_v13 = vld [vmem:[%s5048_s7 + $0x60] sm:$0xff]  }
 0x139   :  { %3830 = vmatpush3.bf16.msra.mxu0 %v4132_v21  ;;  %v4138_v16 = vld [vmem:[%s5048_s7 + $0x20] sm:$0xff]   ;;  %3852 = vmatpush3.bf16.msra.mxu1 %v4148_v30 }
 0x13a   :  { %3831 = vmatprep.subr.bf16.mxu0 %v4133_v22  ;;  %3853 = vmatprep.subr.bf16.mxu1 %v4149_v31 }
 0x13d   :  { %3832 = vmatpush3.bf16.msra.mxu0 %v4134_v23  ;;  %3854 = vmatpush3.bf16.msra.mxu1 %v4150_v34 }
 0x13e   :  { %3833 = vmatprep.subr.bf16.mxu0 %v4135_v24  ;;  %3855 = vmatprep.subr.bf16.mxu1 %v4151_v35 }
 0x141   :  { %3834 = vmatpush3.bf16.msra.mxu0 %v4136_v25  ;;  %3856 = vmatpush3.bf16.msra.mxu1 %v4152_v38 }
 0x142   :  { %3835 = vmatprep.subr.bf16.mxu0 %v4137_v13  ;;  %3857 = vmatprep.subr.bf16.mxu1 %v4153_v39  ;;  %v545_v13 = vrot.slane %v528_v60, %v4677_v43 }
 0x145   :  { %3836 = vmatpush3.bf16.msra.mxu0 %v4138_v16  ;;  %3858 = vmatpush3.bf16.msra.mxu1 %v4154_v44  ;;  %v541_v16 = vrot.slane %v528_v60, %v4682_v45  ;;  %v1743_v60 = vld [vmem:[%s5042_s1 + $0x8] sm:$0xff] }
 0x146   :  { %3837 = vmatprep.subr.bf16.mxu0 %v4139_v26  ;;  %3859 = vmatprep.subr.bf16.mxu1 %v4155_v46 }
 0x149   :  { %3838 = vmatpush3.bf16.msra.mxu0 %v4140_v27  ;;  %3860 = vmatpush3.bf16.msra.mxu1 %v4156_v47 }
 0x14a   :  { %3839 = vmatprep.subr.bf16.mxu0 %v4141_v28  ;;  %3861 = vmatprep.subr.bf16.mxu1 %v4157_v48 }
 0x14d   :  { %3840 = vmatpush3.bf16.msra.mxu0 %v4142_v32  ;;  %3862 = vmatpush3.bf16.msra.mxu1 %v4158_v49 }
 0x14e   :  { %3841 = vmatprep.subr.bf16.mxu0 %v4143_v33  ;;  %3863 = vmatprep.subr.bf16.mxu1 %v4159_v50 }
 0x151   :  { %3842 = vmatpush3.bf16.msra.mxu0 %v4144_v36  ;;  %3864 = vmatpush3.bf16.msra.mxu1 %v4160_v51 }
 0x152   :  { %3843 = vmatprep.subr.bf16.mxu0 %v4145_v37  ;;  %3865 = vmatprep.subr.bf16.mxu1 %v4161_v52  ;;  %v1742_v52 = vld [vmem:[%s5042_s1] sm:$0xff] }
 0x155   :  { %3844 = vmatpush3.bf16.msra.mxu0 %v4146_v40  ;;  %3866 = vmatpush3.bf16.msra.mxu1 %v4162_v53  ;;  %v1744_v53 = vadd.f32 1e-20, %v1742_v52 }
 0x157   :  { %4394 = vlog2.f32 %v1744_v53 }
 0x1b8   :  { %v1224_v2 = vpop.f32.mrf.mxu0  ;;  %v1267_v3 = vpop.f32.mrf.mxu1 }
 0x1b9   :  { %v1225_v7 = vadd.f32 %v1224_v2, %v533_v1 }
 0x1ba   :  { %v1226_v4 = vpop.f32.mrf.mxu0  ;;  %v1269_v6 = vpop.f32.mrf.mxu1 }
 0x1bb   :  { %v1227_v5 = vadd.f32 %v1226_v4, %v537_v63  ;;  %v1268_v17 = vadd.f32 %v1267_v3, %v1225_v7 }
 0x1bc   :  { %v1228_v8 = vpop.f32.mrf.mxu0  ;;  %v1271_v10 = vpop.f32.mrf.mxu1 }
 0x1bd   :  { %v1229_v9 = vadd.f32 %v1228_v8, %v533_v1  ;;  %v1270_v12 = vadd.f32 %v1269_v6, %v1227_v5  ;;  %v1362_v23 = vmax.f32 %v1268_v17, 0.0  ;;  %v4395_v1 = vpop.eup %4394  ;;  %v3626_v17 = vld [vmem:[%s5049_s8] ss:$0 sm:$0xff] }
 0x1be   :  { %v1230_v11 = vpop.f32.mrf.mxu0  ;;  %v1273_v18 = vpop.f32.mrf.mxu1  ;;  %v1747_v2 = vmul.f32 0.6931472, %v4395_v1  ;;  %v4163_v1 = vld [vmem:[%s5055_s14] ss:$20 sps:$4 sm:$0xff]  }
 0x1bf   :  { %v1272_v14 = vadd.f32 %v1271_v10, %v1229_v9  ;;  %v1231_v15 = vadd.f32 %v1230_v11, %v537_v63  ;;  %v1363_v21 = vmax.f32 %v1270_v12, 0.0  ;;  %v1745_v63 = vadd.f32 1e-20, %v1743_v60 }
 0x1c0   :  { %v1750_v4 = vsub.f32 0.0, %v1747_v2  ;;  %v4165_v2 = vld [vmem:[%s5055_s14 + $0x4] ss:$20 sps:$4 sm:$0xff]  }
 0x1c1   :  { %v1274_v19 = vadd.f32 %v1273_v18, %v1231_v15  ;;  %v1366_v20 = vmax.f32 %v1272_v14, 0.0  ;;  %4396 = vlog2.f32 %v1745_v63  ;;  %1834 = vmatprep.subr.bf16.mxu0 %v4165_v2  ;;  %v4220_v2 = vld [vmem:[#allocation5 + $0x1e4] ss:$16 sps:$4 sm:$0xff]  }
 0x1c2   :  { %v1752_v6 = vadd.f32 1e-20, %v1750_v4  ;;  %v4168_v4 = vld [vmem:[%s5055_s14 + $0xc] ss:$20 sps:$4 sm:$0xff]  }
 0x1c3   :  { %v1367_v22 = vmax.f32 %v1274_v19, 0.0  ;;  %v1370_v25 = vpack.c.bf16 %v1366_v20, %v1362_v23  ;;  %1877 = vmatprep.subr.bf16.mxu1 %v4168_v4  ;;  %v4218_v4 = vld [vmem:[#allocation5 + $0x1e0] ss:$16 sps:$4 sm:$0xff]  }
 0x1c4   :  { %4398 = vlog2.f32 %v1752_v6 }
 0x1c5   :  { %v1371_v24 = vpack.c.bf16 %v1367_v22, %v1363_v21 }
 0x1c7   :  { %1669 = vmatprep.mubr.bf16.mxu0 %v1371_v24 }
 0x1c8   :  { %1670 = vmatmul.mubr.bf16.vlgmr.msra.gmra.mxu0 %v1370_v25 }
 0x1c9   :  { %1852 = vmatprep.mubr.bf16.mxu0 %v4508_v0  ;;  %1835 = vmatpush1.bf16.msra.mxu0 %v4163_v1  ;;  %v4215_v1 = vld [vmem:[#allocation5 + $0x200] ss:$16 sps:$4 sm:$0xff]  }
 0x1ce   :  { %v4397_v3 = vpop.eup %4396 }
 0x1cf   :  { %v1749_v5 = vmul.f32 0.6931472, %v4397_v3  ;;  %v4166_v3 = vld [vmem:[%s5055_s14 + $0x8] ss:$20 sps:$4 sm:$0xff]  }
 0x1d1   :  { %v1751_v7 = vsub.f32 0.0, %v1749_v5  ;;  %v4399_v10 = vpop.eup %4398  ;;  %v4509_v5 = vmov 0.0  }
 0x1d2   :  { %v1755_v12 = vmul.f32 0.6931472, %v4399_v10  ;;  %3919 = vmatprep.subr.bf16.mxu0 %v4509_v5 }
 0x1d4   :  { %v1758_v21 = vsub.f32 0.0, %v1755_v12 }
 0x1f8   :  { %v1310_v26 = vpop.f32.mrf.mxu0  ;;  %v1353_v27 = vpop.f32.mrf.mxu1 }
 0x1f9   :  { %v1311_v31 = vadd.f32 %v1310_v26, %v541_v16 }
 0x1fa   :  { %v1312_v28 = vpop.f32.mrf.mxu0  ;;  %v1355_v30 = vpop.f32.mrf.mxu1 }
 0x1fb   :  { %v1313_v29 = vadd.f32 %v1312_v28, %v545_v13  ;;  %v1354_v39 = vadd.f32 %v1353_v27, %v1311_v31 }
 0x1fc   :  { %v1314_v32 = vpop.f32.mrf.mxu0  ;;  %v1357_v34 = vpop.f32.mrf.mxu1 }
 0x1fd   :  { %v1315_v33 = vadd.f32 %v1314_v32, %v541_v16  ;;  %v1356_v36 = vadd.f32 %v1355_v30, %v1313_v29  ;;  %v1364_v49 = vmax.f32 %v1354_v39, 0.0 }
 0x1fe   :  { %v1316_v35 = vpop.f32.mrf.mxu0  ;;  %v1359_v40 = vpop.f32.mrf.mxu1 }
 0x1ff   :  { %v1358_v37 = vadd.f32 %v1357_v34, %v1315_v33  ;;  %v1317_v38 = vadd.f32 %v1316_v35, %v545_v13  ;;  %v1365_v47 = vmax.f32 %v1356_v36, 0.0 }
 0x201   :  { %v1360_v44 = vadd.f32 %v1359_v40, %v1317_v38  ;;  %v1368_v46 = vmax.f32 %v1358_v37, 0.0 }
 0x203   :  { %v1369_v48 = vmax.f32 %v1360_v44, 0.0  ;;  %v1372_v51 = vpack.c.bf16 %v1368_v46, %v1364_v49 }
 0x205   :  { %v1373_v50 = vpack.c.bf16 %v1369_v48, %v1365_v47 }
 0x207   :  { %1710 = vmatprep.mubr.bf16.mxu1 %v1373_v50 }
 0x208   :  { %1711 = vmatmul.mubr.bf16.vlgmr.msra.gmra.mxu1 %v1372_v51 }
 0x209   :  { %1895 = vmatprep.mubr.bf16.mxu1 %v4508_v0  ;;  %v1753_v0 = vadd.f32 1e-20, %v1751_v7  ;;  %1878 = vmatpush1.bf16.msra.mxu1 %v4166_v3  ;;  %v4223_v3 = vld [vmem:[#allocation5 + $0x3e4] ss:$16 sps:$4 sm:$0xff]  }
 0x20b   :  { %4400 = vlog2.f32 %v1753_v0 }
 0x218   :  { %v4401_v15 = vpop.eup %4400 }
 0x219   :  { %v1757_v25 = vmul.f32 0.6931472, %v4401_v15  ;;  %v4169_v15 = vld [vmem:[%s5055_s14 + $0x10] ss:$20 sps:$4 sm:$0xff]  }
 0x21b   :  { %v1759_v30 = vsub.f32 0.0, %v1757_v25  ;;  %v4181_v25 = vld [vmem:[#allocation5 + $0x2c4] ss:$16 sps:$4 sm:$0xff]  }
 0x288   :  { %v3845_v8 = vpop.f32.mrf.mxu0 }
 0x28a   :  { %v3846_v9 = vpop.f32.mrf.mxu0 }
 0x28b   :  { %v3847_v14 = vadd.f32 %v3846_v9, %v3845_v8 }
 0x28c   :  { %v3848_v11 = vpop.f32.mrf.mxu0 }
 0x28d   :  { %v1672_v22 = vadd.f32 %v3847_v14, %v3626_v17 }
 0x28e   :  { %v3849_v18 = vpop.f32.mrf.mxu0 }
 0x28f   :  { %v3850_v23 = vadd.f32 %v3849_v18, %v3848_v11 }
 0x291   :  { %v1675_v27 = vadd.f32 %v3850_v23, %v3626_v17  ;;  %v4173_v23 = vld [vmem:[#allocation5 + $0x2e0] ss:$16 sps:$4 sm:$0xff]  }
 0x2c8   :  { %v3867_v19 = vpop.f32.mrf.mxu1 }
 0x2ca   :  { %v3868_v20 = vpop.f32.mrf.mxu1 }
 0x2cb   :  { %v3869_v24 = vadd.f32 %v3868_v20, %v3867_v19  ;;  %v4172_v20 = vld [vmem:[#allocation5 + $0xe4] ss:$16 sps:$4 sm:$0xff]  }
 0x2cc   :  { %v3870_v13 = vpop.f32.mrf.mxu1  ;;  %2814 = vmatprep.subr.bf16.mxu1 %v4172_v20  ;;  %v4244_v20 = vld [vmem:[#allocation5 + $0x164] ss:$16 sps:$4 sm:$0xff]  }
 0x2cd   :  { %v4826_v16 = vadd.f32 %v3869_v24, %v1672_v22  ;;  %v4170_v22 = vld [vmem:[#allocation5 + $0xe0] ss:$16 sps:$4 sm:$0xff]   ;;  %v4178_v24 = vld [vmem:[#allocation5 + $0xc4] ss:$16 sps:$4 sm:$0xff]  }
 0x2ce   :  { %v3871_v26 = vpop.f32.mrf.mxu1 }
 0x2cf   :  { %v3872_v28 = vadd.f32 %v3871_v26, %v3870_v13  ;;  %v1760_v29 = vadd.f32 %v1758_v21, %v4826_v16  ;;  %v1720_v35 = vsel %vm1719_vm1, %v4826_v16, -inf  ;;  %v4175_v21 = vld [vmem:[#allocation5 + $0x2e4] ss:$16 sps:$4 sm:$0xff]   ;;  %v4176_v13 = vld [vmem:[#allocation5 + $0xc0] ss:$16 sps:$4 sm:$0xff]  }
 0x2d0   :  { %v4179_v26 = vld [vmem:[#allocation5 + $0x2c0] ss:$16 sps:$4 sm:$0xff]  }
 0x2d1   :  { %v4829_v31 = vadd.f32 %v3872_v28, %v1675_v27  ;;  %v1762_v32 = vsel %vm1719_vm1, %v1760_v29, -inf  ;;  %v4184_v27 = vld [vmem:[#allocation5 + $0xa4] ss:$16 sps:$4 sm:$0xff]  }
 0x2d2   :  { %1763 = vmax.xlane.f32.xlu0 %v1762_v32  ;;  %v4187_v28 = vld [vmem:[#allocation5 + $0x2a4] ss:$16 sps:$4 sm:$0xff]  }
 0x2d3   :  { %v1761_v33 = vadd.f32 %v1759_v30, %v4829_v31  ;;  %v1723_v60 = vsel %vm1719_vm1, %v4829_v31, -inf  ;;  %v4185_v30 = vld [vmem:[#allocation5 + $0x2a0] ss:$16 sps:$4 sm:$0xff]   ;;  %v4190_v32 = vld [vmem:[#allocation5 + $0x84] ss:$16 sps:$4 sm:$0xff]  }
 0x2d5   :  { %v1765_v34 = vsel %vm1719_vm1, %v1761_v33, -inf }
 0x2d6   :  { %1766 = vmax.xlane.f32.xlu0 %v1765_v34  ;;  %v4188_v34 = vld [vmem:[#allocation5 + $0x80] ss:$16 sps:$4 sm:$0xff]  }
 0x2da   :  { %1721 = vmax.xlane.f32.xlu0 %v1720_v35  ;;  %v4191_v35 = vld [vmem:[#allocation5 + $0x280] ss:$16 sps:$4 sm:$0xff]  }
 0x35b   :  { %v1764_v36 = vpop.xlane.xlu0 %1763 }
 0x35c   :  { %v1768_v37 = vsub.f32 %v1760_v29, %v1764_v36  ;;  %v4182_v29 = vld [vmem:[#allocation5 + $0xa0] ss:$16 sps:$4 sm:$0xff]   ;;  %v4196_v36 = vld [vmem:[#allocation5 + $0x64] ss:$16 sps:$4 sm:$0xff]  }
 0x35e   :  { %v1770_v38 = vmul.f32 1.442695, %v1768_v37  ;;  %v4199_v37 = vld [vmem:[#allocation5 + $0x264] ss:$16 sps:$4 sm:$0xff]  }
 0x35f   :  { %v1767_v39 = vpop.xlane.xlu0 %1766 }
 0x360   :  { %4402 = vpow2.f32 %v1770_v38  ;;  %v1769_v40 = vsub.f32 %v1761_v33, %v1767_v39  ;;  %v4193_v33 = vld [vmem:[#allocation5 + $0x284] ss:$16 sps:$4 sm:$0xff]   ;;  %v4194_v38 = vld [vmem:[#allocation5 + $0x60] ss:$16 sps:$4 sm:$0xff]  }
 0x361   :  { %v4197_v39 = vld [vmem:[#allocation5 + $0x260] ss:$16 sps:$4 sm:$0xff]  }
 0x362   :  { %v1772_v44 = vmul.f32 1.442695, %v1769_v40  ;;  %v4202_v40 = vld [vmem:[#allocation5 + $0x44] ss:$16 sps:$4 sm:$0xff]  }
 0x363   :  { %v1722_v46 = vpop.xlane.xlu0 %1721 }
 0x364   :  { %4404 = vpow2.f32 %v1772_v44  ;;  %v1726_v47 = vsub.f32 %v4826_v16, %v1722_v46  ;;  %v4205_v44 = vld [vmem:[#allocation5 + $0x244] ss:$16 sps:$4 sm:$0xff]   ;;  %v4200_v46 = vld [vmem:[#allocation5 + $0x40] ss:$16 sps:$4 sm:$0xff]  }
 0x366   :  { %v1728_v48 = vmul.f32 1.442695, %v1726_v47  ;;  %v4203_v47 = vld [vmem:[#allocation5 + $0x240] ss:$16 sps:$4 sm:$0xff]  }
 0x368   :  { %4406 = vpow2.f32 %v1728_v48  ;;  %v4208_v48 = vld [vmem:[#allocation5 + $0x24] ss:$16 sps:$4 sm:$0xff]  }
 0x36d   :  { %v4403_v49 = vpop.eup %4402 }
 0x36e   :  { %v1774_v50 = vsel %vm1719_vm1, %v4403_v49, 0.0 }
 0x36f   :  { %1775 = vadd.xlane.f32.xlu1 %v1774_v50  ;;  %v4206_v50 = vld [vmem:[#allocation5 + $0x20] ss:$16 sps:$4 sm:$0xff]  }
 0x371   :  { %v4405_v51 = vpop.eup %4404 }
 0x372   :  { %v1777_v52 = vsel %vm1719_vm1, %v4405_v51, 0.0 }
 0x373   :  { %1778 = vadd.xlane.f32.xlu1 %v1777_v52  ;;  %v4214_v52 = vld [vmem:[#allocation5 + $0x4] ss:$16 sps:$4 sm:$0xff]  }
 0x375   :  { %v4839_v53 = vpop.eup %4406 }
 0x376   :  { %v1732_v63 = vsel %vm1719_vm1, %v4839_v53, 0.0 }
 0x377   :  { %1724 = vmax.xlane.f32.xlu1 %v1723_v60  ;;  %1733 = vadd.xlane.f32.xlu0 %v1732_v63  ;;  %v4217_v60 = vld [vmem:[#allocation5 + $0x204] ss:$16 sps:$4 sm:$0xff]   ;;  %v4212_v63 = vld [vmem:[#allocation5] ss:$16 sps:$4 sm:$0xff]  }
 0x3f8   :  { %v1776_v6 = vpop.xlane.xlu1 %1775 }
 0x3f9   :  { %4408 = vrcp.f32 %v1776_v6  ;;  %v4226_v6 = vld [vmem:[#allocation5 + $0x1c4] ss:$16 sps:$4 sm:$0xff]  }
 0x3fc   :  { %v1779_v7 = vpop.xlane.xlu1 %1778 }
 0x3fd   :  { %4410 = vrcp.f32 %v1779_v7  ;;  %v4229_v7 = vld [vmem:[#allocation5 + $0x3c4] ss:$16 sps:$4 sm:$0xff]  }
 0x400   :  { %v1725_v0 = vpop.xlane.xlu1 %1724 }
 0x401   :  { %v1727_v8 = vsub.f32 %v4829_v31, %v1725_v0  ;;  %v4224_v0 = vld [vmem:[#allocation5 + $0x1c0] ss:$16 sps:$4 sm:$0xff]  }
 0x403   :  { %v1730_v9 = vmul.f32 1.442695, %v1727_v8  ;;  %v4227_v8 = vld [vmem:[#allocation5 + $0x3c0] ss:$16 sps:$4 sm:$0xff]  }
 0x405   :  { %4412 = vpow2.f32 %v1730_v9  ;;  %v4232_v9 = vld [vmem:[#allocation5 + $0x1a4] ss:$16 sps:$4 sm:$0xff]  }
 0x406   :  { %v4409_v10 = vpop.eup %4408 }
 0x407   :  { %v1782_v12 = vmul.f32 %v4409_v10, %v4403_v49  ;;  %v4211_v49 = vld [vmem:[#allocation5 + $0x224] ss:$16 sps:$4 sm:$0xff]  }
 0x408   :  { %v4235_v10 = vld [vmem:[#allocation5 + $0x3a4] ss:$16 sps:$4 sm:$0xff]  }
 0x40a   :  { %v4411_v11 = vpop.eup %4410 }
 0x40b   :  { %v1783_v14 = vmul.f32 %v4411_v11, %v4405_v51  ;;  %v4209_v51 = vld [vmem:[#allocation5 + $0x220] ss:$16 sps:$4 sm:$0xff]  }
 0x40c   :  { %v4230_v11 = vld [vmem:[#allocation5 + $0x1a0] ss:$16 sps:$4 sm:$0xff]  }
 0x40d   :  { %v1784_v17 = vpack.c.bf16 %v1783_v14, %v1782_v12  ;;  %v4233_v12 = vld [vmem:[#allocation5 + $0x3a0] ss:$16 sps:$4 sm:$0xff]   ;;  %v4238_v14 = vld [vmem:[#allocation5 + $0x184] ss:$16 sps:$4 sm:$0xff]  }
 0x40f   :  { %3664 = vmatmul.mubr.msk.bf16.vlgmr.msra.gmra.mxu0 %vm1719_vm1, %v1784_v17  ;;  %3665 = vmatmul.mubr.msk.bf16.vlgmr.msra.gmra.mxu1 %vm1719_vm1, %v1784_v17 }
 0x410   :  { %3920 = vmatpush3.bf16.msra.mxu0 %v4169_v15  ;;  %3921 = vmatprep.mubr.msk.bf16.mxu0 %vm4510_vm2, %v4509_v5  ;;  %v4221_v5 = vld [vmem:[#allocation5 + $0x3e0] ss:$16 sps:$4 sm:$0xff]   ;;  %v4241_v15 = vld [vmem:[#allocation5 + $0x384] ss:$16 sps:$4 sm:$0xff]  }
 0x411   :  { %2857 = vmatprep.subr.bf16.mxu0 %v4175_v21  ;;  %2815 = vmatpush1.bf16.msra.mxu1 %v4170_v22  ;;  %v4247_v21 = vld [vmem:[#allocation5 + $0x364] ss:$16 sps:$4 sm:$0xff]   ;;  %v4242_v22 = vld [vmem:[#allocation5 + $0x160] ss:$16 sps:$4 sm:$0xff]  }
 0x412   :  { %v4863_v18 = vpop.eup %4412  ;;  %2816 = vmatprep.subr.bf16.mxu1 %v4178_v24  ;;  %v4250_v24 = vld [vmem:[#allocation5 + $0x144] ss:$16 sps:$4 sm:$0xff]  }
 0x413   :  { %v1735_v19 = vsel %vm1719_vm1, %v4863_v18, 0.0 }
 0x414   :  { %1736 = vadd.xlane.f32.xlu1 %v1735_v19  ;;  %v4239_v19 = vld [vmem:[#allocation5 + $0x380] ss:$16 sps:$4 sm:$0xff]  }
 0x415   :  { %2817 = vmatpush1.bf16.msra.mxu1 %v4176_v13  ;;  %v4248_v13 = vld [vmem:[#allocation5 + $0x140] ss:$16 sps:$4 sm:$0xff]  }
 0x416   :  { %2818 = vmatprep.subr.bf16.mxu1 %v4184_v27  ;;  %v4256_v27 = vld [vmem:[#allocation5 + $0x124] ss:$16 sps:$4 sm:$0xff]  }
 0x417   :  { %3922 = vmatmul.mubr.msk.bf16.vlgmr.msra.gmra.mxu0 %vm1719_vm1, %v1784_v17  ;;  %v4236_v17 = vld [vmem:[#allocation5 + $0x180] ss:$16 sps:$4 sm:$0xff]  }
 0x418   :  { %2858 = vmatpush1.bf16.msra.mxu0 %v4173_v23  ;;  %v4245_v23 = vld [vmem:[#allocation5 + $0x360] ss:$16 sps:$4 sm:$0xff]  }
 0x419   :  { %2859 = vmatprep.subr.bf16.mxu0 %v4181_v25  ;;  %2819 = vmatpush1.bf16.msra.mxu1 %v4182_v29  ;;  %v4253_v25 = vld [vmem:[#allocation5 + $0x344] ss:$16 sps:$4 sm:$0xff]   ;;  %v4254_v29 = vld [vmem:[#allocation5 + $0x120] ss:$16 sps:$4 sm:$0xff]  }
 0x41a   :  { %2820 = vmatprep.subr.bf16.mxu1 %v4190_v32  ;;  %v4262_v32 = vld [vmem:[#allocation5 + $0x104] ss:$16 sps:$4 sm:$0xff]  }
 0x41c   :  { %2860 = vmatpush1.bf16.msra.mxu0 %v4179_v26  ;;  %v4251_v26 = vld [vmem:[#allocation5 + $0x340] ss:$16 sps:$4 sm:$0xff]  }
 0x41d   :  { %2861 = vmatprep.subr.bf16.mxu0 %v4187_v28  ;;  %2821 = vmatpush1.bf16.msra.mxu1 %v4188_v34  ;;  %v4259_v28 = vld [vmem:[#allocation5 + $0x324] ss:$16 sps:$4 sm:$0xff]   ;;  %v4260_v34 = vld [vmem:[#allocation5 + $0x100] ss:$16 sps:$4 sm:$0xff]  }
 0x41e   :  { %2822 = vmatprep.subr.bf16.mxu1 %v4196_v36  ;;  %v4268_v36 = vld [vmem:[#allocation5 + $0xec] ss:$16 sps:$4 sm:$0xff]  }
 0x420   :  { %2862 = vmatpush1.bf16.msra.mxu0 %v4185_v30  ;;  %v4257_v30 = vld [vmem:[#allocation5 + $0x320] ss:$16 sps:$4 sm:$0xff]  }
 0x421   :  { %2863 = vmatprep.subr.bf16.mxu0 %v4193_v33  ;;  %2823 = vmatpush1.bf16.msra.mxu1 %v4194_v38  ;;  %v4265_v33 = vld [vmem:[#allocation5 + $0x304] ss:$16 sps:$4 sm:$0xff]  }
 0x422   :  { %2824 = vmatprep.subr.bf16.mxu1 %v4202_v40  ;;  %v1982_v40 = vld [vmem:[%s5050_s9] sm:$0xf]  ;;  %s4514_s9 = smov 64  }
 0x424   :  { %2864 = vmatpush1.bf16.msra.mxu0 %v4191_v35  ;;  %v4263_v35 = vld [vmem:[#allocation5 + $0x300] ss:$16 sps:$4 sm:$0xff]  }
 0x425   :  { %2865 = vmatprep.subr.bf16.mxu0 %v4199_v37  ;;  %2825 = vmatpush1.bf16.msra.mxu1 %v4200_v46  ;;  %v4271_v37 = vld [vmem:[#allocation5 + $0x2ec] ss:$16 sps:$4 sm:$0xff]  }
 0x426   :  { %2826 = vmatprep.subr.bf16.mxu1 %v4208_v48  ;;  %v1991_v48 = vrot.slane %v1982_v40, %v4673_v41 }
 0x428   :  { %2866 = vmatpush1.bf16.msra.mxu0 %v4197_v39 }
 0x429   :  { %2867 = vmatprep.subr.bf16.mxu0 %v4205_v44  ;;  %2827 = vmatpush1.bf16.msra.mxu1 %v4206_v50  ;;  %v1999_v50 = vrot.slane %v1982_v40, %v4677_v43 }
 0x42a   :  { %2828 = vmatprep.subr.bf16.mxu1 %v4214_v52  ;;  %v1987_v52 = vrot.slane %v1982_v40, %v4675_v42 }
 0x42c   :  { %2868 = vmatpush1.bf16.msra.mxu0 %v4203_v47 }
 0x42d   :  { %2869 = vmatprep.subr.bf16.mxu0 %v4211_v49  ;;  %2829 = vmatpush1.bf16.msra.mxu1 %v4212_v63  ;;  %v1995_v63 = vrot.slane %v1982_v40, %v4682_v45  ;;  %v4287_v40 = vld [vmem:[#allocation5 + $0x288] ss:$16 sps:$4 sm:$0xff]  }
 0x42e   :  { %2830 = vmatprep.subr.bf16.mxu1 %v4220_v2 }
 0x430   :  { %2870 = vmatpush1.bf16.msra.mxu0 %v4209_v51 }
 0x431   :  { %2871 = vmatprep.subr.bf16.mxu0 %v4217_v60  ;;  %2831 = vmatpush2.bf16.msra.mxu1 %v4218_v4 }
 0x432   :  { %2832 = vmatprep.subr.bf16.mxu1 %v4226_v6 }
 0x434   :  { %2872 = vmatpush1.bf16.msra.mxu0 %v4215_v1 }
 0x435   :  { %2873 = vmatprep.subr.bf16.mxu0 %v4223_v3  ;;  %2833 = vmatpush2.bf16.msra.mxu1 %v4224_v0 }
 0x436   :  { %2834 = vmatprep.subr.bf16.mxu1 %v4232_v9 }
 0x438   :  { %2874 = vmatpush2.bf16.msra.mxu0 %v4221_v5 }
 0x439   :  { %2875 = vmatprep.subr.bf16.mxu0 %v4229_v7  ;;  %2835 = vmatpush2.bf16.msra.mxu1 %v4230_v11 }
 0x43a   :  { %2836 = vmatprep.subr.bf16.mxu1 %v4238_v14 }
 0x43c   :  { %2876 = vmatpush2.bf16.msra.mxu0 %v4227_v8 }
 0x43d   :  { %2877 = vmatprep.subr.bf16.mxu0 %v4235_v10  ;;  %2837 = vmatpush2.bf16.msra.mxu1 %v4236_v17 }
 0x43e   :  { %2838 = vmatprep.subr.bf16.mxu1 %v4244_v20 }
 0x440   :  { %2878 = vmatpush2.bf16.msra.mxu0 %v4233_v12 }
 0x441   :  { %2879 = vmatprep.subr.bf16.mxu0 %v4241_v15  ;;  %2839 = vmatpush2.bf16.msra.mxu1 %v4242_v22 }
 0x442   :  { %2840 = vmatprep.subr.bf16.mxu1 %v4250_v24  ;;  %v4266_v24 = vld [vmem:[#allocation5 + $0xe8] ss:$16 sps:$4 sm:$0xff]  }
 0x444   :  { %2880 = vmatpush2.bf16.msra.mxu0 %v4239_v19 }
 0x445   :  { %2881 = vmatprep.subr.bf16.mxu0 %v4247_v21  ;;  %2841 = vmatpush2.bf16.msra.mxu1 %v4248_v13 }
 0x446   :  { %2842 = vmatprep.subr.bf16.mxu1 %v4256_v27 }
 0x448   :  { %2882 = vmatpush2.bf16.msra.mxu0 %v4245_v23 }
 0x449   :  { %2883 = vmatprep.subr.bf16.mxu0 %v4253_v25  ;;  %2843 = vmatpush2.bf16.msra.mxu1 %v4254_v29  ;;  %v4269_v25 = vld [vmem:[#allocation5 + $0x2e8] ss:$16 sps:$4 sm:$0xff]   ;;  %v4277_v29 = vld [vmem:[#allocation5 + $0x2cc] ss:$16 sps:$4 sm:$0xff]  }
 0x44a   :  { %2844 = vmatprep.subr.bf16.mxu1 %v4262_v32  ;;  %v4275_v32 = vld [vmem:[#allocation5 + $0x2c8] ss:$16 sps:$4 sm:$0xff]  }
 0x44c   :  { %2884 = vmatpush2.bf16.msra.mxu0 %v4251_v26 }
 0x44d   :  { %2885 = vmatprep.subr.bf16.mxu0 %v4259_v28  ;;  %2845 = vmatpush2.bf16.msra.mxu1 %v4260_v34  ;;  %v4274_v28 = vld [vmem:[#allocation5 + $0xcc] ss:$16 sps:$4 sm:$0xff]  }
 0x44e   :  { %2900 = vmatprep.subr.bf16.mxu1 %v4268_v36  ;;  %v4283_v34 = vld [vmem:[#allocation5 + $0x2ac] ss:$16 sps:$4 sm:$0xff]   ;;  %v4281_v36 = vld [vmem:[#allocation5 + $0x2a8] ss:$16 sps:$4 sm:$0xff]  }
 0x450   :  { %2886 = vmatpush2.bf16.msra.mxu0 %v4257_v30  ;;  %v4272_v30 = vld [vmem:[#allocation5 + $0xc8] ss:$16 sps:$4 sm:$0xff]  }
 0x451   :  { %2887 = vmatprep.subr.bf16.mxu0 %v4265_v33  ;;  %v4280_v33 = vld [vmem:[#allocation5 + $0xac] ss:$16 sps:$4 sm:$0xff]  }
 0x454   :  { %2888 = vmatpush2.bf16.msra.mxu0 %v4263_v35  ;;  %v4278_v35 = vld [vmem:[#allocation5 + $0xa8] ss:$16 sps:$4 sm:$0xff]  }
 0x455   :  { %2943 = vmatprep.subr.bf16.mxu0 %v4271_v37  ;;  %v4286_v37 = vld [vmem:[#allocation5 + $0x8c] ss:$16 sps:$4 sm:$0xff]  }
 0x4cf   :  { %v1854_v38 = vpop.f32.mrf.mxu0  ;;  %v1897_v39 = vpop.f32.mrf.mxu1 }
 0x4d0   :  { %v1974_v51 = vadd.f32 %v1854_v38, %v4792_v54  ;;  %v1976_v60 = vadd.f32 %v1897_v39, %v4794_v55  ;;  %v4289_v38 = vld [vmem:[#allocation5 + $0x28c] ss:$16 sps:$4 sm:$0xff]   ;;  %v4284_v39 = vld [vmem:[#allocation5 + $0x88] ss:$16 sps:$4 sm:$0xff]  }
 0x4d1   :  { %v1856_v44 = vpop.f32.mrf.mxu0  ;;  %v1899_v46 = vpop.f32.mrf.mxu1 }
 0x4d2   :  { %v1975_v47 = vadd.f32 %v1856_v44, %v4796_v56  ;;  %v1977_v49 = vadd.f32 %v1899_v46, %v4798_v57  ;;  %v2004_v0 = vadd.f32 %v1987_v52, %v1974_v51  ;;  %v2006_v8 = vadd.f32 %v1995_v63, %v1976_v60  ;;  %v4292_v44 = vld [vmem:[#allocation5 + $0x6c] ss:$16 sps:$4 sm:$0xff]   ;;  %v4296_v51 = vld [vmem:[#allocation5 + $0x48] ss:$16 sps:$4 sm:$0xff]  }
 0x4d3   :  { %v1858_v1 = vpop.f32.mrf.mxu0  ;;  %v1901_v2 = vpop.f32.mrf.mxu1  ;;  %v4295_v46 = vld [vmem:[#allocation5 + $0x26c] ss:$16 sps:$4 sm:$0xff]  }
 0x4d4   :  { %v1978_v3 = vadd.f32 %v1858_v1, %v4800_v58  ;;  %v1980_v56 = vadd.f32 %v1901_v2, %v4802_v59  ;;  %v2005_v6 = vadd.f32 %v1991_v48, %v1975_v47  ;;  %v2007_v57 = vadd.f32 %v1999_v50, %v1977_v49  ;;  %v4290_v47 = vld [vmem:[#allocation5 + $0x68] ss:$16 sps:$4 sm:$0xff]   ;;  %v4298_v49 = vld [vmem:[#allocation5 + $0x4c] ss:$16 sps:$4 sm:$0xff]  }
 0x4d5   :  { %v1860_v4 = vpop.f32.mrf.mxu0  ;;  %v1903_v5 = vpop.f32.mrf.mxu1  ;;  %v2012_v21 = vmax.f32 %v2004_v0, 0.0  ;;  %v2014_v22 = vmax.f32 %v2006_v8, 0.0  ;;  %v4304_v60 = vld [vmem:[#allocation5 + $0x2c] ss:$16 sps:$4 sm:$0xff]   ;;  %v4302_v1 = vld [vmem:[#allocation5 + $0x28] ss:$16 sps:$4 sm:$0xff]  }
 0x4d6   :  { %v1979_v7 = vadd.f32 %v1860_v4, %v4807_v61  ;;  %v1981_v54 = vadd.f32 %v1903_v5, %v4809_v62  ;;  %v2008_v9 = vadd.f32 %v1987_v52, %v1978_v3  ;;  %v2010_v55 = vadd.f32 %v1995_v63, %v1980_v56  ;;  %v4299_v52 = vld [vmem:[#allocation5 + $0x248] ss:$16 sps:$4 sm:$0xff]   ;;  %v4307_v63 = vld [vmem:[#allocation5 + $0x22c] ss:$16 sps:$4 sm:$0xff]  }
 0x4d7   :  { %v4883_v10 = vpop.f32.mrf.mxu0  ;;  %v2013_v59 = vmax.f32 %v2005_v6, 0.0  ;;  %v2015_v17 = vmax.f32 %v2007_v57, 0.0  ;;  %v4305_v2 = vld [vmem:[#allocation5 + $0x228] ss:$16 sps:$4 sm:$0xff]   ;;  %v4310_v3 = vld [vmem:[#allocation5 + $0xc] ss:$16 sps:$4 sm:$0xff]  }
 0x4d8   :  { %v2009_v11 = vadd.f32 %v1991_v48, %v1979_v7  ;;  %v2011_v12 = vadd.f32 %v1999_v50, %v1981_v54  ;;  %v2016_v14 = vmax.f32 %v2008_v9, 0.0  ;;  %v2018_v58 = vmax.f32 %v2010_v55, 0.0  ;;  %v4293_v48 = vld [vmem:[#allocation5 + $0x268] ss:$16 sps:$4 sm:$0xff]   ;;  %v4301_v50 = vld [vmem:[#allocation5 + $0x24c] ss:$16 sps:$4 sm:$0xff]  }
 0x4d9   :  { %v3923_v15 = vpop.f32.mrf.mxu0  ;;  %v4313_v56 = vld [vmem:[#allocation5 + $0x20c] ss:$16 sps:$4 sm:$0xff]   ;;  %v4308_v4 = vld [vmem:[#allocation5 + $0x8] ss:$16 sps:$4 sm:$0xff]  }
 0x4da   :  { %v2017_v19 = vmax.f32 %v2009_v11, 0.0  ;;  %v2019_v20 = vmax.f32 %v2011_v12, 0.0  ;;  %v4887_v13 = vpack.c.bf16 %v2016_v14, %v2012_v21  ;;  %v4889_v26 = vpack.c.bf16 %v2018_v58, %v2014_v22  ;;  %v4311_v5 = vld [vmem:[#allocation5 + $0x208] ss:$16 sps:$4 sm:$0xff]   ;;  %v4316_v6 = vld [vmem:[#allocation5 + $0x1ec] ss:$16 sps:$4 sm:$0xff]  }
 0x4db   :  { %v4885_v61 = vpop.f32.mrf.mxu0  ;;  %v4319_v57 = vld [vmem:[#allocation5 + $0x3ec] ss:$16 sps:$4 sm:$0xff]   ;;  %v4314_v7 = vld [vmem:[#allocation5 + $0x1e8] ss:$16 sps:$4 sm:$0xff]  }
 0x4dc   :  { %v2021_v62 = vpack.c.bf16 %v2017_v19, %v2013_v59  ;;  %v2023_v23 = vpack.c.bf16 %v2019_v20, %v2015_v17  ;;  %v4317_v54 = vld [vmem:[#allocation5 + $0x3e8] ss:$16 sps:$4 sm:$0xff]   ;;  %v4322_v0 = vld [vmem:[#allocation5 + $0x1cc] ss:$16 sps:$4 sm:$0xff]  }
 0x4dd   :  { %v3924_v27 = vpop.f32.mrf.mxu0  ;;  %v4325_v8 = vld [vmem:[#allocation5 + $0x3cc] ss:$16 sps:$4 sm:$0xff]   ;;  %v4320_v9 = vld [vmem:[#allocation5 + $0x1c8] ss:$16 sps:$4 sm:$0xff]  }
 0x4de   :  { %2846 = vmatprep.mubr.bf16.mxu1 %v2021_v62  ;;  %2889 = vmatprep.mubr.bf16.mxu0 %v2023_v23  ;;  %v4323_v55 = vld [vmem:[#allocation5 + $0x3c8] ss:$16 sps:$4 sm:$0xff]   ;;  %v4328_v11 = vld [vmem:[#allocation5 + $0x1ac] ss:$16 sps:$4 sm:$0xff]  }
 0x4df   :  { %2847 = vmatmul.mubr.bf16.vlgmr.msra.gmra.mxu1 %v4887_v13  ;;  %2890 = vmatmul.mubr.bf16.vlgmr.msra.gmra.mxu0 %v4889_v26  ;;  %v4331_v12 = vld [vmem:[#allocation5 + $0x3ac] ss:$16 sps:$4 sm:$0xff]   ;;  %v4326_v14 = vld [vmem:[#allocation5 + $0x1a8] ss:$16 sps:$4 sm:$0xff]  }
 0x4e0   :  { %2901 = vmatpush1.bf16.msra.mxu1 %v4266_v24  ;;  %2944 = vmatpush1.bf16.msra.mxu0 %v4269_v25  ;;  %v4329_v58 = vld [vmem:[#allocation5 + $0x3a8] ss:$16 sps:$4 sm:$0xff]   ;;  %v4334_v15 = vld [vmem:[#allocation5 + $0x18c] ss:$16 sps:$4 sm:$0xff]  }
 0x4e1   :  { %2932 = vmatprep.mubr.bf16.mxu1 %v2021_v62  ;;  %2975 = vmatprep.mubr.bf16.mxu0 %v2023_v23  ;;  %v4337_v59 = vld [vmem:[#allocation5 + $0x38c] ss:$16 sps:$4 sm:$0xff]   ;;  %v4332_v17 = vld [vmem:[#allocation5 + $0x188] ss:$16 sps:$4 sm:$0xff]  }
 0x4e2   :  { %2902 = vmatprep.subr.bf16.mxu1 %v4274_v28  ;;  %2945 = vmatprep.subr.bf16.mxu0 %v4277_v29  ;;  %v4335_v19 = vld [vmem:[#allocation5 + $0x388] ss:$16 sps:$4 sm:$0xff]   ;;  %v4340_v20 = vld [vmem:[#allocation5 + $0x16c] ss:$16 sps:$4 sm:$0xff]  }
 0x4e3   :  { %v4343_v21 = vld [vmem:[#allocation5 + $0x36c] ss:$16 sps:$4 sm:$0xff]   ;;  %v4338_v22 = vld [vmem:[#allocation5 + $0x168] ss:$16 sps:$4 sm:$0xff]  }
 0x4e4   :  { %2903 = vmatpush1.bf16.msra.mxu1 %v4272_v30  ;;  %2946 = vmatpush1.bf16.msra.mxu0 %v4275_v32  ;;  %v4341_v62 = vld [vmem:[#allocation5 + $0x368] ss:$16 sps:$4 sm:$0xff]   ;;  %v4346_v23 = vld [vmem:[#allocation5 + $0x14c] ss:$16 sps:$4 sm:$0xff]  }
 0x4e5   :  { %2904 = vmatprep.subr.bf16.mxu1 %v4280_v33  ;;  %2947 = vmatprep.subr.bf16.mxu0 %v4283_v34  ;;  %v4349_v24 = vld [vmem:[#allocation5 + $0x34c] ss:$16 sps:$4 sm:$0xff]   ;;  %v4344_v25 = vld [vmem:[#allocation5 + $0x148] ss:$16 sps:$4 sm:$0xff]  }
 0x4e6   :  { %v4347_v27 = vld [vmem:[#allocation5 + $0x348] ss:$16 sps:$4 sm:$0xff]   ;;  %v4352_v28 = vld [vmem:[#allocation5 + $0x12c] ss:$16 sps:$4 sm:$0xff]  }
 0x4e7   :  { %v4355_v29 = vld [vmem:[#allocation5 + $0x32c] ss:$16 sps:$4 sm:$0xff]   ;;  %v4350_v30 = vld [vmem:[#allocation5 + $0x128] ss:$16 sps:$4 sm:$0xff]  }
 0x4e8   :  { %2905 = vmatpush1.bf16.msra.mxu1 %v4278_v35  ;;  %2948 = vmatpush1.bf16.msra.mxu0 %v4281_v36  ;;  %v4353_v32 = vld [vmem:[#allocation5 + $0x328] ss:$16 sps:$4 sm:$0xff]   ;;  %v4358_v33 = vld [vmem:[#allocation5 + $0x10c] ss:$16 sps:$4 sm:$0xff]  }
 0x4e9   :  { %2906 = vmatprep.subr.bf16.mxu1 %v4286_v37  ;;  %2949 = vmatprep.subr.bf16.mxu0 %v4289_v38  ;;  %v4361_v34 = vld [vmem:[#allocation5 + $0x30c] ss:$16 sps:$4 sm:$0xff]   ;;  %v4356_v35 = vld [vmem:[#allocation5 + $0x108] ss:$16 sps:$4 sm:$0xff]  }
 0x4ea   :  { %v4359_v36 = vld [vmem:[#allocation5 + $0x308] ss:$16 sps:$4 sm:$0xff]  }
 0x4eb   :  { %v4362_v37 = vld [vmem:[%s5053_s12 + $0x78] sm:$0xff]  }
 0x4ec   :  { %2907 = vmatpush1.bf16.msra.mxu1 %v4284_v39  ;;  %2950 = vmatpush1.bf16.msra.mxu0 %v4287_v40  ;;  %v4363_v38 = vld [vmem:[%s5053_s12 + $0x38] sm:$0xff]   ;;  %v4364_v39 = vld [vmem:[%s5053_s12 + $0x70] sm:$0xff]  }
 0x4ed   :  { %2908 = vmatprep.subr.bf16.mxu1 %v4292_v44  ;;  %2951 = vmatprep.subr.bf16.mxu0 %v4295_v46  ;;  %v4365_v40 = vld [vmem:[%s5053_s12 + $0x30] sm:$0xff]   ;;  %v4366_v44 = vld [vmem:[%s5053_s12 + $0x68] sm:$0xff]  }
 0x4ee   :  { %v4367_v46 = vld [vmem:[%s5053_s12 + $0x28] sm:$0xff]  }
 0x4f0   :  { %2909 = vmatpush1.bf16.msra.mxu1 %v4290_v47  ;;  %2952 = vmatpush1.bf16.msra.mxu0 %v4293_v48  ;;  %v4370_v47 = vld [vmem:[%s5053_s12 + $0x58] sm:$0xff]  }
 0x4f1   :  { %2910 = vmatprep.subr.bf16.mxu1 %v4298_v49  ;;  %2953 = vmatprep.subr.bf16.mxu0 %v4301_v50  ;;  %v4371_v48 = vld [vmem:[%s5053_s12 + $0x18] sm:$0xff]   ;;  %v4372_v49 = vld [vmem:[%s5053_s12 + $0x50] sm:$0xff]  }
 0x4f2   :  { %v4378_v50 = vld [vmem:[%s5053_s12 + $0xf8] sm:$0xff]  }
 0x4f4   :  { %2911 = vmatpush1.bf16.msra.mxu1 %v4296_v51  ;;  %2954 = vmatpush1.bf16.msra.mxu0 %v4299_v52  ;;  %v4379_v51 = vld [vmem:[%s5053_s12 + $0xb8] sm:$0xff]   ;;  %v4380_v52 = vld [vmem:[%s5053_s12 + $0xf0] sm:$0xff]  }
 0x4f5   :  { %2912 = vmatprep.subr.bf16.mxu1 %v4304_v60  ;;  %2955 = vmatprep.subr.bf16.mxu0 %v4307_v63  ;;  %v4373_v60 = vld [vmem:[%s5053_s12 + $0x10] sm:$0xff]   ;;  %v4374_v63 = vld [vmem:[%s5053_s12 + $0x48] sm:$0xff]  }
 0x4f8   :  { %2913 = vmatpush1.bf16.msra.mxu1 %v4302_v1  ;;  %2956 = vmatpush1.bf16.msra.mxu0 %v4305_v2  ;;  %v4381_v1 = vld [vmem:[%s5053_s12 + $0xb0] sm:$0xff]   ;;  %v4382_v2 = vld [vmem:[%s5053_s12 + $0xe8] sm:$0xff]  }
 0x4f9   :  { %2914 = vmatprep.subr.bf16.mxu1 %v4310_v3  ;;  %2957 = vmatprep.subr.bf16.mxu0 %v4313_v56  ;;  %v4375_v3 = vld [vmem:[%s5053_s12 + $0x8] sm:$0xff]   ;;  %v4376_v56 = vld [vmem:[%s5053_s12 + $0x40] sm:$0xff]  }
 0x4fc   :  { %2915 = vmatpush1.bf16.msra.mxu1 %v4308_v4  ;;  %2958 = vmatpush1.bf16.msra.mxu0 %v4311_v5  ;;  %v4383_v4 = vld [vmem:[%s5053_s12 + $0xa8] sm:$0xff]   ;;  %v4384_v5 = vld [vmem:[%s5053_s12 + $0xe0] sm:$0xff]  }
 0x4fd   :  { %2916 = vmatprep.subr.bf16.mxu1 %v4316_v6  ;;  %2959 = vmatprep.subr.bf16.mxu0 %v4319_v57  ;;  %v4377_v6 = vld [vmem:[%s5053_s12] sm:$0xff]  }
 0x4fe   :  { %v4385_v57 = vld [vmem:[%s5053_s12 + $0xa0] sm:$0xff]  }
 0x500   :  { %2917 = vmatpush2.bf16.msra.mxu1 %v4314_v7  ;;  %2960 = vmatpush2.bf16.msra.mxu0 %v4317_v54  ;;  %v4386_v7 = vld [vmem:[%s5053_s12 + $0xd8] sm:$0xff]  }
 0x501   :  { %2918 = vmatprep.subr.bf16.mxu1 %v4322_v0  ;;  %2961 = vmatprep.subr.bf16.mxu0 %v4325_v8  ;;  %v4387_v54 = vld [vmem:[%s5053_s12 + $0x98] sm:$0xff]   ;;  %v4388_v0 = vld [vmem:[%s5053_s12 + $0xd0] sm:$0xff]  }
 0x502   :  { %v4389_v8 = vld [vmem:[%s5053_s12 + $0x90] sm:$0xff]  }
 0x504   :  { %2919 = vmatpush2.bf16.msra.mxu1 %v4320_v9  ;;  %2962 = vmatpush2.bf16.msra.mxu0 %v4323_v55  ;;  %v4390_v9 = vld [vmem:[%s5053_s12 + $0xc8] sm:$0xff]  }
 0x505   :  { %2920 = vmatprep.subr.bf16.mxu1 %v4328_v11  ;;  %2963 = vmatprep.subr.bf16.mxu0 %v4331_v12  ;;  %v4391_v55 = vld [vmem:[%s5053_s12 + $0x88] sm:$0xff]   ;;  %v4392_v11 = vld [vmem:[%s5053_s12 + $0xc0] sm:$0xff]  }
 0x506   :  { %v4393_v12 = vld [vmem:[%s5053_s12 + $0x80] sm:$0xff]  }
 0x508   :  { %2921 = vmatpush2.bf16.msra.mxu1 %v4326_v14  ;;  %2964 = vmatpush2.bf16.msra.mxu0 %v4329_v58  ;;  %v2152_v14 = vld [vmem:[%s5052_s11] sm:$0xf] }
 0x509   :  { %2922 = vmatprep.subr.bf16.mxu1 %v4334_v15  ;;  %2965 = vmatprep.subr.bf16.mxu0 %v4337_v59  ;;  %v2161_v58 = vrot.slane %v2152_v14, %v4673_v41  ;;  %v2157_v15 = vrot.slane %v2152_v14, %v4675_v42 }
 0x50c   :  { %2923 = vmatpush2.bf16.msra.mxu1 %v4332_v17  ;;  %2966 = vmatpush2.bf16.msra.mxu0 %v4335_v19 }
 0x50d   :  { %2924 = vmatprep.subr.bf16.mxu1 %v4340_v20  ;;  %2967 = vmatprep.subr.bf16.mxu0 %v4343_v21 }
 0x510   :  { %2925 = vmatpush2.bf16.msra.mxu1 %v4338_v22  ;;  %2968 = vmatpush2.bf16.msra.mxu0 %v4341_v62 }
 0x511   :  { %2926 = vmatprep.subr.bf16.mxu1 %v4346_v23  ;;  %2969 = vmatprep.subr.bf16.mxu0 %v4349_v24 }
 0x514   :  { %2927 = vmatpush2.bf16.msra.mxu1 %v4344_v25  ;;  %2970 = vmatpush2.bf16.msra.mxu0 %v4347_v27 }
 0x515   :  { %2928 = vmatprep.subr.bf16.mxu1 %v4352_v28  ;;  %2971 = vmatprep.subr.bf16.mxu0 %v4355_v29 }
 0x518   :  { %2929 = vmatpush2.bf16.msra.mxu1 %v4350_v30  ;;  %2972 = vmatpush2.bf16.msra.mxu0 %v4353_v32 }
 0x519   :  { %2930 = vmatprep.subr.bf16.mxu1 %v4358_v33  ;;  %2973 = vmatprep.subr.bf16.mxu0 %v4361_v34 }
 0x51c   :  { %2931 = vmatpush2.bf16.msra.mxu1 %v4356_v35  ;;  %2974 = vmatpush2.bf16.msra.mxu0 %v4359_v36 }
 0x51d   :  { %3875 = vmatprep.subr.bf16.mxu1 %v4362_v37  ;;  %3897 = vmatprep.subr.bf16.mxu0 %v4378_v50 }
 0x51f   :  { %2933 = vmatmul.mubr.bf16.vlgmr.msra.gmra.mxu1 %v4887_v13  ;;  %2976 = vmatmul.mubr.bf16.vlgmr.msra.gmra.mxu0 %v4889_v26  ;;  %v4368_v13 = vld [vmem:[%s5053_s12 + $0x60] sm:$0xff]  }
 0x520   :  { %3876 = vmatpush3.bf16.msra.mxu1 %v4363_v38  ;;  %v4369_v26 = vld [vmem:[%s5053_s12 + $0x20] sm:$0xff]   ;;  %3898 = vmatpush3.bf16.msra.mxu0 %v4379_v51  ;;  %v2169_v38 = vrot.slane %v2152_v14, %v4677_v43 }
 0x521   :  { %3877 = vmatprep.subr.bf16.mxu1 %v4364_v39  ;;  %3899 = vmatprep.subr.bf16.mxu0 %v4380_v52  ;;  %v2165_v39 = vrot.slane %v2152_v14, %v4682_v45 }
 0x524   :  { %3878 = vmatpush3.bf16.msra.mxu1 %v4365_v40  ;;  %3900 = vmatpush3.bf16.msra.mxu0 %v4381_v1 }
 0x525   :  { %3879 = vmatprep.subr.bf16.mxu1 %v4366_v44  ;;  %3901 = vmatprep.subr.bf16.mxu0 %v4382_v2 }
 0x528   :  { %3880 = vmatpush3.bf16.msra.mxu1 %v4367_v46  ;;  %3902 = vmatpush3.bf16.msra.mxu0 %v4383_v4 }
 0x529   :  { %3881 = vmatprep.subr.bf16.mxu1 %v4368_v13  ;;  %3903 = vmatprep.subr.bf16.mxu0 %v4384_v5 }
 0x52c   :  { %3882 = vmatpush3.bf16.msra.mxu1 %v4369_v26  ;;  %3904 = vmatpush3.bf16.msra.mxu0 %v4385_v57 }
 0x52d   :  { %3883 = vmatprep.subr.bf16.mxu1 %v4370_v47  ;;  %3905 = vmatprep.subr.bf16.mxu0 %v4386_v7 }
 0x530   :  { %3884 = vmatpush3.bf16.msra.mxu1 %v4371_v48  ;;  %3906 = vmatpush3.bf16.msra.mxu0 %v4387_v54 }
 0x531   :  { %3885 = vmatprep.subr.bf16.mxu1 %v4372_v49  ;;  %3907 = vmatprep.subr.bf16.mxu0 %v4388_v0 }
 0x534   :  { %3886 = vmatpush3.bf16.msra.mxu1 %v4373_v60  ;;  %3908 = vmatpush3.bf16.msra.mxu0 %v4389_v8  ;;  %v3796_v8 = vld [vmem:[%s5054_s13] ss:$0 sm:$0xff]  ;;  %s4511_s13 = smov 112  }
 0x535   :  { %3887 = vmatprep.subr.bf16.mxu1 %v4374_v63  ;;  %3909 = vmatprep.subr.bf16.mxu0 %v4390_v9 }
 0x538   :  { %3888 = vmatpush3.bf16.msra.mxu1 %v4375_v3  ;;  %3910 = vmatpush3.bf16.msra.mxu0 %v4391_v55 }
 0x539   :  { %3889 = vmatprep.subr.bf16.mxu1 %v4376_v56  ;;  %3911 = vmatprep.subr.bf16.mxu0 %v4392_v11 }
 0x53c   :  { %3890 = vmatpush3.bf16.msra.mxu1 %v4377_v6  ;;  %3912 = vmatpush3.bf16.msra.mxu0 %v4393_v12 }
 0x59f   :  { %v2848_v59 = vpop.f32.mrf.mxu1  ;;  %v2891_v17 = vpop.f32.mrf.mxu0 }
 0x5a0   :  { %v2849_v22 = vadd.f32 %v2848_v59, %v2157_v15 }
 0x5a1   :  { %v2850_v19 = vpop.f32.mrf.mxu1  ;;  %v2893_v20 = vpop.f32.mrf.mxu0 }
 0x5a2   :  { %v2851_v21 = vadd.f32 %v2850_v19, %v2161_v58  ;;  %v2892_v30 = vadd.f32 %v2891_v17, %v2849_v22 }
 0x5a3   :  { %v2852_v62 = vpop.f32.mrf.mxu1  ;;  %v2895_v23 = vpop.f32.mrf.mxu0 }
 0x5a4   :  { %v2853_v24 = vadd.f32 %v2852_v62, %v2157_v15  ;;  %v2894_v27 = vadd.f32 %v2893_v20, %v2851_v21  ;;  %v2986_v42 = vmax.f32 %v2892_v30, 0.0 }
 0x5a5   :  { %v2854_v25 = vpop.f32.mrf.mxu1  ;;  %v2897_v32 = vpop.f32.mrf.mxu0 }
 0x5a6   :  { %v2896_v28 = vadd.f32 %v2895_v23, %v2853_v24  ;;  %v2855_v29 = vadd.f32 %v2854_v25, %v2161_v58  ;;  %v2987_v41 = vmax.f32 %v2894_v27, 0.0 }
 0x5a8   :  { %v2898_v33 = vadd.f32 %v2897_v32, %v2855_v29  ;;  %v2990_v34 = vmax.f32 %v2896_v28, 0.0 }
 0x5aa   :  { %v2991_v35 = vmax.f32 %v2898_v33, 0.0  ;;  %v2994_v37 = vpack.c.bf16 %v2990_v34, %v2986_v42 }
 0x5ac   :  { %v2995_v36 = vpack.c.bf16 %v2991_v35, %v2987_v41 }
 0x5ae   :  { %3293 = vmatprep.mubr.bf16.mxu1 %v2995_v36 }
 0x5af   :  { %3294 = vmatmul.mubr.bf16.vlgmr.msra.gmra.mxu1 %v2994_v37 }
 0x5df   :  { %v2934_v40 = vpop.f32.mrf.mxu1  ;;  %v2977_v44 = vpop.f32.mrf.mxu0 }
 0x5e0   :  { %v2935_v47 = vadd.f32 %v2934_v40, %v2165_v39 }
 0x5e1   :  { %v2936_v46 = vpop.f32.mrf.mxu1  ;;  %v2979_v13 = vpop.f32.mrf.mxu0 }
 0x5e2   :  { %v2937_v26 = vadd.f32 %v2936_v46, %v2169_v38  ;;  %v2978_v1 = vadd.f32 %v2977_v44, %v2935_v47  ;;  %v1734_v44 = vpop.xlane.xlu0 %1733  ;;  %v1737_v46 = vpop.xlane.xlu1 %1736 }
 0x5e3   :  { %v2938_v48 = vpop.f32.mrf.mxu1  ;;  %v2981_v49 = vpop.f32.mrf.mxu0 }
 0x5e4   :  { %v2939_v50 = vadd.f32 %v2938_v48, %v2165_v39  ;;  %v2980_v52 = vadd.f32 %v2979_v13, %v2937_v26  ;;  %v2988_v45 = vmax.f32 %v2978_v1, 0.0 }
 0x5e5   :  { %v2940_v51 = vpop.f32.mrf.mxu1  ;;  %v2983_v2 = vpop.f32.mrf.mxu0 }
 0x5e6   :  { %v2982_v60 = vadd.f32 %v2981_v49, %v2939_v50  ;;  %v2941_v63 = vadd.f32 %v2940_v51, %v2169_v38  ;;  %v2989_v43 = vmax.f32 %v2980_v52, 0.0 }
 0x5e8   :  { %v2984_v3 = vadd.f32 %v2983_v2, %v2941_v63  ;;  %v2992_v56 = vmax.f32 %v2982_v60, 0.0 }
 0x5ea   :  { %v2993_v4 = vmax.f32 %v2984_v3, 0.0  ;;  %v2996_v6 = vpack.c.bf16 %v2992_v56, %v2988_v45  ;;  %v3667_v56 = vld [vmem:[%s5056_s15] ss:$0 sm:$0xff] }
 0x5ec   :  { %v2997_v5 = vpack.c.bf16 %v2993_v4, %v2989_v43  ;;  %v1954_v43 = vadd.f32 %v3667_v56, %v4883_v10 }
 0x5ee   :  { %3334 = vmatprep.mubr.bf16.mxu0 %v2997_v5  ;;  %v1958_v45 = vand.u32 2147483647, %v1954_v43 }
 0x5ef   :  { %3335 = vmatmul.mubr.bf16.vlgmr.msra.gmra.mxu0 %v2996_v6 }
 0x5f0   :  { %v1960_v5 = vsub.f32 0.0, %v1958_v45 }
 0x66f   :  { %v3891_v57 = vpop.f32.mrf.mxu1 }
 0x671   :  { %v3892_v7 = vpop.f32.mrf.mxu1 }
 0x672   :  { %v3893_v0 = vadd.f32 %v3892_v7, %v3891_v57  ;;  %v1962_v57 = vmul.f32 1.442695, %v1960_v5 }
 0x673   :  { %v3894_v54 = vpop.f32.mrf.mxu1 }
 0x674   :  { %v3296_v12 = vadd.f32 %v3893_v0, %v3796_v8 }
 0x675   :  { %v3895_v9 = vpop.f32.mrf.mxu1 }
 0x676   :  { %v3896_v14 = vadd.f32 %v3895_v9, %v3894_v54 }
 0x678   :  { %v3299_v19 = vadd.f32 %v3896_v14, %v3796_v8 }
 0x6af   :  { %v3913_v55 = vpop.f32.mrf.mxu0 }
 0x6b1   :  { %v3914_v11 = vpop.f32.mrf.mxu0 }
 0x6b2   :  { %v3915_v58 = vadd.f32 %v3914_v11, %v3913_v55 }
 0x6b3   :  { %v3916_v15 = vpop.f32.mrf.mxu0 }
 0x6b4   :  { %v5001_v59 = vadd.f32 %v3915_v58, %v3296_v12  ;;  %v3362_v12 = vld [vmem:[%s5043_s2 + $0x8] sm:$0xff] }
 0x6b5   :  { %v3917_v17 = vpop.f32.mrf.mxu0 }
 0x6b6   :  { %v3345_v20 = vand.u32 2147483647, %v5001_v59  ;;  %v3918_v21 = vadd.f32 %v3917_v17, %v3916_v15  ;;  %v3343_v34 = vmax.f32 %v5001_v59, 0.0 }
 0x6b8   :  { %v3347_v22 = vsub.f32 0.0, %v3345_v20  ;;  %v5004_v62 = vadd.f32 %v3918_v21, %v3299_v19  ;;  %v1956_v19 = vmax.f32 %v1954_v43, 0.0 }
 0x6ba   :  { %v3349_v23 = vmul.f32 1.442695, %v3347_v22  ;;  %v3346_v24 = vand.u32 2147483647, %v5004_v62  ;;  %v3344_v37 = vmax.f32 %v5004_v62, 0.0 }
 0x6bc   :  { %4414 = vpow2.f32 %v3349_v23  ;;  %v3348_v25 = vsub.f32 0.0, %v3346_v24 }
 0x6be   :  { %v3351_v27 = vmul.f32 1.442695, %v3348_v25 }
 0x6c0   :  { %4416 = vpow2.f32 %v3351_v27 }
 0x6c9   :  { %v4415_v28 = vpop.eup %4414 }
 0x6ca   :  { %v3353_v29 = vadd.f32 1.0, %v4415_v28 }
 0x6cc   :  { %4418 = vlog2.f32 %v3353_v29 }
 0x6cd   :  { %v4417_v30 = vpop.eup %4416 }
 0x6ce   :  { %v3354_v32 = vadd.f32 1.0, %v4417_v30 }
 0x6d0   :  { %4420 = vlog2.f32 %v3354_v32 }
 0x6d9   :  { %v4419_v33 = vpop.eup %4418 }
 0x6da   :  { %v3356_v41 = vmul.f32 0.6931472, %v4419_v33 }
 0x6dc   :  { %v3359_v35 = vadd.f32 %v3356_v41, %v3343_v34 }
 0x6dd   :  { %v4421_v42 = vpop.eup %4420 }
 0x6de   :  { %v3363_v36 = vadd.f32 1e-10, %v3359_v35  ;;  %v3358_v38 = vmul.f32 0.6931472, %v4421_v42 }
 0x6e0   :  { %v3360_v39 = vadd.f32 %v3358_v38, %v3344_v37  ;;  %4422 = vrsqrt.f32 %v3363_v36  ;;  %vm3367_vm3 = vcmp.eq.f32.partialorder %v3363_v36, inf  ;;  %v3370_v47 = vand.u32 2147483648, %v3363_v36 }
 0x6e1   :  { %vm3369_vm4 = vcmp.eq.f32.partialorder %v3363_v36, 0.0 }
 0x6e2   :  { %v3364_v40 = vadd.f32 1e-10, %v3360_v39 }
 0x6e4   :  { %4424 = vrsqrt.f32 %v3364_v40  ;;  %vm3374_vm5 = vcmp.eq.f32.partialorder %v3364_v40, inf  ;;  %v3377_v52 = vand.u32 2147483648, %v3364_v40  ;;  %vm3376_vm6 = vcmp.eq.f32.partialorder %v3364_v40, 0.0 }
 0x6e5   :  { %4426 = vrcp.f32 %v1734_v44 }
 0x6e6   :  { %4428 = vrcp.f32 %v1737_v46 }
 0x6e7   :  { %4430 = vpow2.f32 %v1962_v57 }
 0x6ed   :  { %v4423_v13 = vpop.eup %4422 }
 0x6ee   :  { %v3366_v26 = vmul.f32 %v4423_v13, %v3363_v36 }
 0x6f0   :  { %v3368_v48 = vsel %vm3367_vm3, %v3363_v36, %v3366_v26 }
 0x6f1   :  { %v4425_v49 = vpop.eup %4424  ;;  %v3371_v50 = vsel %vm3369_vm4, %v3370_v47, %v3368_v48 }
 0x6f2   :  { %3381 = vrot.lane.b32.xlu0 %v3371_v50, %s4511_s13  ;;  %v3373_v51 = vmul.f32 %v4425_v49, %v3364_v40  ;;  %v4427_v63 = vpop.eup %4426 }
 0x6f3   :  { %v1739_v2 = vmul.f32 %v4427_v63, %v4839_v53  ;;  %v4429_v3 = vpop.eup %4428  ;;  %v1955_v53 = vadd.f32 %v3667_v56, %v4885_v61  ;;  %v3361_v61 = vld [vmem:[%s5043_s2] sm:$0xff]  ;;  %s4515_s2 = smov [#allocation7]  }
 0x6f4   :  { %v3375_v60 = vsel %vm3374_vm5, %v3364_v40, %v3373_v51  ;;  %v1741_v4 = vmul.f32 %v4429_v3, %v4863_v18  ;;  %v4431_v18 = vpop.eup %4430  ;;  %s3465_s29 = sshll.u32 %s4515_s2, 4  ;;  %s3466_s29 = int_to_ptr.vmem [resolvable:$true] %s3465_s29 }
 0x6f5   :  { %v3378_v1 = vsel %vm3376_vm6, %v3377_v52, %v3375_v60  ;;  %v1959_v6 = vand.u32 2147483647, %v1955_v53  ;;  %v1966_v54 = vadd.f32 1.0, %v4431_v18  ;;  %v1957_v24 = vmax.f32 %v1955_v53, 0.0  ;;  %s4478_s30 = scalar_lea.vmem %s3466_s29, 256  ;;  %p4483_p11 = scmp.lt.s32.totalorder %s3466_s29, %s3466_s29 }
 0x6f6   :  { %3383 = vrot.lane.b32.xlu1 %v3378_v1, %s4511_s13  ;;  %3401 = vrot.lane.b32.xlu0 %v5001_v59, %s4512_s23  ;;  %p4479_p10 = scmp.ne.s32.totalorder %s3466_s29, %s4478_s30  ;;  %p4484_p12 = scmp.lt.s32.totalorder %s4478_s30, %s4478_s30 }
 0x6f7   :  { %v1961_v7 = vsub.f32 0.0, %v1959_v6 }
 0x6f8   :  { %p4485_p13 = por %p4484_p12, %p4483_p11 }
 0x6f9   :  { %v1964_v10 = vmul.f32 1.442695, %v1961_v7 }
 0x6fa   :  { %3409 = vrot.lane.b32.xlu0 %v3359_v35, %s4512_s23  ;;  %3393 = vrot.lane.b32.xlu1 %v1739_v2, %s4506_s25  ;;  %p4486_p0 = pnand %p4485_p13, %p4479_p10 }
 0x6fb   :  { %4432 = vpow2.f32 %v1964_v10 }
 0x6fc   :  { %4434 = vlog2.f32 %v1966_v54 }
 0x6fe   :  { %3425 = vrot.lane.b32.xlu0 %v1954_v43, %s4513_s27  ;;  %3395 = vrot.lane.b32.xlu1 %v1741_v4, %s4506_s25 }
 0x702   :  { %3403 = vrot.lane.b32.xlu1 %v5004_v62, %s4512_s23 }
 0x706   :  { %3411 = vrot.lane.b32.xlu1 %v3360_v39, %s4512_s23 }
 0x708   :  { %v4433_v0 = vpop.eup %4432 }
 0x709   :  { %v1967_v8 = vadd.f32 1.0, %v4433_v0  ;;  %v4435_v9 = vpop.eup %4434 }
 0x70a   :  { %3427 = vrot.lane.b32.xlu1 %v1955_v53, %s4513_s27  ;;  %v1969_v58 = vmul.f32 0.6931472, %v4435_v9 }
 0x70b   :  { %4436 = vlog2.f32 %v1967_v8 }
 0x70c   :  { %v1972_v22 = vadd.f32 %v1969_v58, %v1956_v19 }
 0x718   :  { %v4437_v15 = vpop.eup %4436 }
 0x719   :  { %v1971_v23 = vmul.f32 0.6931472, %v4437_v15 }
 0x71b   :  { %v1973_v25 = vadd.f32 %v1971_v23, %v1957_v24 }
 0x764   :  { %v3382_v55 = vpop.permute.xlu0 %3381 }
 0x765   :  { %v3387_v11 = vmul.f32 %v3382_v55, %v3361_v61 }
 0x767   :  { %v3389_v14 = vadd.f32 %v3387_v11, %v5001_v59 }
 0x768   :  { %v3384_v17 = vpop.permute.xlu1 %3383  ;;  %v3402_v28 = vpop.permute.xlu0 %3401 }
 0x769   :  { %v3388_v20 = vmul.f32 %v3384_v17, %v3362_v12  ;;  %3417 = vrot.lane.b32.xlu0 %v3389_v14, %s4514_s9 }
 0x76b   :  { %v3390_v21 = vadd.f32 %v3388_v20, %v5004_v62 }
 0x76c   :  { %v3394_v27 = vpop.permute.xlu1 %3393  ;;  %v3410_v30 = vpop.permute.xlu0 %3409 }
 0x76d   :  { %3419 = vrot.lane.b32.xlu1 %v3390_v21, %s4514_s9  ;;  %3433 = vrot.lane.b32.xlu0 %v1972_v22, %s4513_s27  ;;  %v3439_v32 = vsel %vm1719_vm1, %v4826_v16, %v3394_v27 }
 0x76e   :  { %v3441_v62 = vsel %vm182_vm0, %v3439_v32, %v3402_v28 }
 0x76f   :  { %v3444_v41 = vsel %vm3443_vm7, %v3441_v62, %v3410_v30 }
 0x770   :  { %v3396_v59 = vpop.permute.xlu1 %3395  ;;  %v3426_v34 = vpop.permute.xlu0 %3425 }
 0x771   :  { %3435 = vrot.lane.b32.xlu1 %v1973_v25, %s4513_s27  ;;  %v3440_v37 = vsel %vm1719_vm1, %v4829_v31, %v3396_v59 }
 0x774   :  { %v3404_v29 = vpop.permute.xlu1 %3403 }
 0x775   :  { %v3442_v38 = vsel %vm182_vm0, %v3440_v37, %v3404_v29 }
 0x778   :  { %v3412_v33 = vpop.permute.xlu1 %3411 }
 0x779   :  { %v3445_v39 = vsel %vm3443_vm7, %v3442_v38, %v3412_v33 }
 0x77c   :  { %v3428_v35 = vpop.permute.xlu1 %3427 }
 0x7db   :  { %v3418_v42 = vpop.permute.xlu0 %3417 }
 0x7dc   :  { %v3447_v36 = vsel %vm3446_vm8, %v3444_v41, %v3418_v42 }
 0x7dd   :  { %v3450_v40 = vsel %vm3449_vm9, %v3447_v36, %v3426_v34 }
 0x7df   :  { %v3420_v16 = vpop.permute.xlu1 %3419  ;;  %v3434_v44 = vpop.permute.xlu0 %3433 }
 0x7e0   :  { %v3448_v46 = vsel %vm3446_vm8, %v3445_v39, %v3420_v16  ;;  %v3453_v13 = vsel %vm3452_vm10, %v3450_v40, %v3434_v44 }
 0x7e1   :  { %v3456_v26 = vsel %vm3455_vm11, %v3453_v13, 0.0  ;;  %v3451_v47 = vsel %vm3449_vm9, %v3448_v46, %v3428_v35 }
 0x7e2   :  { %3458 = vst [vmem:[#allocation7] sm:$0xff] %v3456_v26 }
 0x7e3   :  { %v3436_v48 = vpop.permute.xlu1 %3435 }
 0x7e4   :  { %v3454_v49 = vsel %vm3452_vm10, %v3451_v47, %v3436_v48 }
 0x7e5   :  { %v3457_v50 = vsel %vm3455_vm11, %v3454_v49, 0.0 }
 0x7e6   :  { %3459 = vst [vmem:[#allocation7 + $0x8] sm:$0xff] %v3457_v50 }
 0x7e7   :  { %4489 = shalt.err (!%p4486_p0)
}
 0x7e8   :  { %s4516_s0 = smov 128   ;;  %s4517_s17 = smov 8  }
 0x7e9   :  { %3471 = dma.vmem_to_hbm [thread:$0]  %s3466_s29, 256, %s5057_s16, [#allocation4], %s4516_s0, %s4516_s0, %s4517_s17  }
 0x7ea   :  { %4502 = dma.done.wait [#allocation4], 256  }
 0x7eb   :  { %4503 = vsyncadd [#allocation4], 4294967040 }
 0x7ec   :  { %3475 = vsyncpa [#allocation3], 1 }
 0x7ed   :  { %3476 = vsyncpa [#allocation6], 1 }
 0x7ee   :  { %3477 = vsyncpa [#allocation4], 1 }

</bundles_post_ra>
